<compile_context>
chip_gen: v5e
topology: v5e:2x2
jax: 0.10.0
libtpu: 0.0.40
codegen_flags: <defaults>
</compile_context>

<pallas_src>
import jax
import jax.numpy as jnp
from jax.experimental import pallas as pl
from jax.experimental.pallas import tpu as pltpu

# ---- small, ViT-B/32-shaped (but shrunk) config --------------------------
BATCH = 2
CHANNELS = 3
IMAGE = 16
PATCH = 8
GRID = IMAGE // PATCH
NUM_PATCHES = GRID * GRID            # 4
SEQ = NUM_PATCHES + 1                # 5 = CLS + patches
HIDDEN = 32
NUM_HEADS = 4
HEAD_DIM = HIDDEN // NUM_HEADS       # 8
MLP = 64
LAYERS = 2
PROJ = 16                            # projection_dim (image_embeds width)
EPS = 1e-5
PATCH_DIM = CHANNELS * PATCH * PATCH
ATTN_SCALE = HEAD_DIM ** -0.5

# ---- packed small-vector table: columns of a [3*HIDDEN, VCOLS] array ------
_C_PRE_LN_W, _C_PRE_LN_B, _C_POST_LN_W, _C_POST_LN_B = 0, 1, 2, 3
_C_ADD_EMB = 4                       # SEQ columns: pos emb (+ class emb in col 0)
_C_LAYER = _C_ADD_EMB + SEQ          # start of per-layer blocks
_PER_LAYER = 8                       # ln1_w ln1_b qkv_b ob ln2_w ln2_b fc1_b fc2_b
VROWS = 3 * HIDDEN                   # tallest packed vector is the fused qkv bias
VCOLS = _C_LAYER + _PER_LAYER * LAYERS


def _ln_cols(xT, w_col, b_col):
    """LayerNorm over the feature axis (axis 0) of a [features, seq] tile."""
    mu = jnp.mean(xT, axis=0, keepdims=True)
    var = jnp.mean(jnp.square(xT - mu), axis=0, keepdims=True)
    return (xT - mu) * jax.lax.rsqrt(var + EPS) * w_col + b_col


def clip_vision_kernel(
    patches_ref,      # [1, PATCH_DIM, SEQ]   (CLS column = zeros)
    patch_wT_ref,     # [HIDDEN, PATCH_DIM]
    vecs_ref,         # [VROWS, VCOLS]        packed small vectors (columns)
    qkvwT_ref,        # [L, 3*HIDDEN, HIDDEN] (q rows pre-scaled)
    owT_ref,          # [L, HIDDEN, HIDDEN]
    fc1T_ref,         # [L, MLP, HIDDEN]
    fc2T_ref,         # [L, HIDDEN, MLP]
    projT_ref,        # [PROJ, HIDDEN]
    out_ref,          # [1, PROJ, 1]
):
    def vcol(c, rows=HIDDEN):
        return vecs_ref[:rows, c:c + 1]                     # [rows, 1]

    # patch embedding (conv-as-matmul, transposed) + class/position embeddings
    pT = patches_ref[0]                                     # [PATCH_DIM, SEQ]
    xT = jnp.dot(patch_wT_ref[...], pT, preferred_element_type=jnp.float32)
    xT = xT + vecs_ref[:HIDDEN, _C_ADD_EMB:_C_ADD_EMB + SEQ]

    # CLIP pre-layernorm
    xT = _ln_cols(xT, vcol(_C_PRE_LN_W), vcol(_C_PRE_LN_B))

    for l in range(LAYERS):
        c = _C_LAYER + l * _PER_LAYER

        # ---------------- self-attention block ----------------
        res = xT
        h = _ln_cols(xT, vcol(c + 0), vcol(c + 1))
        # fused QKV projection: one [3H,H] x [H,S] matmul (+ fused bias)
        qkvT = jnp.dot(qkvwT_ref[l], h, preferred_element_type=jnp.float32)
        qkvT = qkvT + vcol(c + 2, 3 * HIDDEN)               # [3H, S]
        hm = qkvT.reshape(3 * NUM_HEADS, HEAD_DIM, SEQ)     # head-major regroup
        q = jnp.swapaxes(hm[:NUM_HEADS], 1, 2)              # [NH, S, HD]
        k = jnp.swapaxes(hm[NUM_HEADS:2 * NUM_HEADS], 1, 2)  # [NH, S, HD]
        v = hm[2 * NUM_HEADS:]                              # [NH, HD, S]

        s = jnp.einsum('hqd,hkd->hqk', q, k,
                       preferred_element_type=jnp.float32)  # [NH, S, S]
        s = s - jnp.max(s, axis=-1, keepdims=True)
        p = jnp.exp(s)
        p = p * pl.reciprocal(jnp.sum(p, axis=-1, keepdims=True), approx=True)
        ctxT = jnp.einsum('hdk,hqk->hdq', v, p,
                          preferred_element_type=jnp.float32)  # [NH, HD, S]

        attnT = jnp.dot(owT_ref[l], ctxT.reshape(HIDDEN, SEQ),
                        preferred_element_type=jnp.float32) + vcol(c + 3)
        xT = res + attnT

        # ---------------- MLP block (quick_gelu) ----------------
        res = xT
        h = _ln_cols(xT, vcol(c + 4), vcol(c + 5))
        m = jnp.dot(fc1T_ref[l], h, preferred_element_type=jnp.float32)
        m = m + vcol(c + 6, MLP)
        m = m * pl.reciprocal(1.0 + jnp.exp(-1.702 * m), approx=True)
        o = jnp.dot(fc2T_ref[l], m, preferred_element_type=jnp.float32)
        xT = res + o + vcol(c + 7)

    # pool CLS token -> post-layernorm -> visual projection (no bias)
    pooled = _ln_cols(xT[:, 0:1], vcol(_C_POST_LN_W), vcol(_C_POST_LN_B))
    out_ref[0] = jnp.dot(projT_ref[...], pooled,
                         preferred_element_type=jnp.float32)   # [PROJ, 1]


def init_params(key):
    ks = jax.random.split(key, 12)

    def nrm(k, shape, scale=0.02):
        return (scale * jax.random.normal(k, shape)).astype(jnp.float32)

    return dict(
        patch_w=nrm(ks[0], (PATCH_DIM, HIDDEN)),
        class_emb=nrm(ks[1], (HIDDEN,)),
        pos_emb=nrm(ks[2], (SEQ, HIDDEN)),
        pre_ln_w=jnp.ones((1, HIDDEN), jnp.float32),
        pre_ln_b=jnp.zeros((1, HIDDEN), jnp.float32),
        ln1_w=jnp.ones((LAYERS, HIDDEN), jnp.float32),
        ln1_b=jnp.zeros((LAYERS, HIDDEN), jnp.float32),
        qw=nrm(ks[3], (LAYERS, HIDDEN, HIDDEN)),
        qb=jnp.zeros((LAYERS, HIDDEN), jnp.float32),
        kw=nrm(ks[4], (LAYERS, HIDDEN, HIDDEN)),
        kb=jnp.zeros((LAYERS, HIDDEN), jnp.float32),
        vw=nrm(ks[5], (LAYERS, HIDDEN, HIDDEN)),
        vb=jnp.zeros((LAYERS, HIDDEN), jnp.float32),
        ow=nrm(ks[6], (LAYERS, HIDDEN, HIDDEN)),
        ob=jnp.zeros((LAYERS, HIDDEN), jnp.float32),
        ln2_w=jnp.ones((LAYERS, HIDDEN), jnp.float32),
        ln2_b=jnp.zeros((LAYERS, HIDDEN), jnp.float32),
        fc1_w=nrm(ks[7], (LAYERS, HIDDEN, MLP)),
        fc1_b=jnp.zeros((LAYERS, MLP), jnp.float32),
        fc2_w=nrm(ks[8], (LAYERS, MLP, HIDDEN)),
        fc2_b=jnp.zeros((LAYERS, HIDDEN), jnp.float32),
        post_ln_w=jnp.ones((1, HIDDEN), jnp.float32),
        post_ln_b=jnp.zeros((1, HIDDEN), jnp.float32),
        proj_w=nrm(ks[9], (HIDDEN, PROJ)),
    )


def _pack_params(params):
    """Repack PyTorch-style params into transposed / fused / packed operands."""
    qkvwT = jnp.concatenate([
        jnp.swapaxes(params['qw'], 1, 2) * ATTN_SCALE,   # scale folded into q
        jnp.swapaxes(params['kw'], 1, 2),
        jnp.swapaxes(params['vw'], 1, 2)], axis=1)       # [L, 3H, H]
    owT = jnp.swapaxes(params['ow'], 1, 2)               # [L, H, H]
    fc1T = jnp.swapaxes(params['fc1_w'], 1, 2)           # [L, MLP, H]
    fc2T = jnp.swapaxes(params['fc2_w'], 1, 2)           # [L, H, MLP]
    patch_wT = params['patch_w'].T                       # [H, PATCH_DIM]
    projT = params['proj_w'].T                           # [PROJ, H]

    add_embT = (params['pos_emb'].at[0].add(params['class_emb'])).T  # [H, S]
    vecs = jnp.zeros((VROWS, VCOLS), jnp.float32)
    vecs = vecs.at[:HIDDEN, _C_PRE_LN_W].set(params['pre_ln_w'].reshape(-1))
    vecs = vecs.at[:HIDDEN, _C_PRE_LN_B].set(params['pre_ln_b'].reshape(-1))
    vecs = vecs.at[:HIDDEN, _C_POST_LN_W].set(params['post_ln_w'].reshape(-1))
    vecs = vecs.at[:HIDDEN, _C_POST_LN_B].set(params['post_ln_b'].reshape(-1))
    vecs = vecs.at[:HIDDEN, _C_ADD_EMB:_C_ADD_EMB + SEQ].set(add_embT)
    for l in range(LAYERS):
        c = _C_LAYER + l * _PER_LAYER
        qkv_b = jnp.concatenate(
            [params['qb'][l] * ATTN_SCALE, params['kb'][l], params['vb'][l]])
        vecs = vecs.at[:HIDDEN, c + 0].set(params['ln1_w'][l])
        vecs = vecs.at[:HIDDEN, c + 1].set(params['ln1_b'][l])
        vecs = vecs.at[:3 * HIDDEN, c + 2].set(qkv_b)
        vecs = vecs.at[:HIDDEN, c + 3].set(params['ob'][l])
        vecs = vecs.at[:HIDDEN, c + 4].set(params['ln2_w'][l])
        vecs = vecs.at[:HIDDEN, c + 5].set(params['ln2_b'][l])
        vecs = vecs.at[:MLP, c + 6].set(params['fc1_b'][l])
        vecs = vecs.at[:HIDDEN, c + 7].set(params['fc2_b'][l])
    return patch_wT, vecs, qkvwT, owT, fc1T, fc2T, projT


@jax.jit
def image_encoder(x_nchw, params):
    B = x_nchw.shape[0]
    # patchify NCHW image (glue only: reshape/transpose, no compute)
    p = x_nchw.reshape(B, CHANNELS, GRID, PATCH, GRID, PATCH)
    p = p.transpose(0, 2, 4, 1, 3, 5).reshape(B, NUM_PATCHES, PATCH_DIM)
    # prepend a zero "patch" so the CLS slot produces zero from the matmul,
    # then transpose to [B, PATCH_DIM, SEQ] (kernel works in [features, seq]).
    p = jnp.concatenate([jnp.zeros((B, 1, PATCH_DIM), p.dtype), p], axis=1)
    pT = jnp.swapaxes(p, 1, 2)

    patch_wT, vecs, qkvwT, owT, fc1T, fc2T, projT = _pack_params(params)

    out = pl.pallas_call(
        clip_vision_kernel,
        out_shape=jax.ShapeDtypeStruct((B, PROJ, 1), jnp.float32),
        grid=(B,),
        in_specs=[
            pl.BlockSpec((1, PATCH_DIM, SEQ), lambda b: (b, 0, 0)),
            pl.BlockSpec((HIDDEN, PATCH_DIM), lambda b: (0, 0)),
            pl.BlockSpec((VROWS, VCOLS), lambda b: (0, 0)),
            pl.BlockSpec((LAYERS, 3 * HIDDEN, HIDDEN), lambda b: (0, 0, 0)),
            pl.BlockSpec((LAYERS, HIDDEN, HIDDEN), lambda b: (0, 0, 0)),
            pl.BlockSpec((LAYERS, MLP, HIDDEN), lambda b: (0, 0, 0)),
            pl.BlockSpec((LAYERS, HIDDEN, MLP), lambda b: (0, 0, 0)),
            pl.BlockSpec((PROJ, HIDDEN), lambda b: (0, 0)),
        ],
        out_specs=pl.BlockSpec((1, PROJ, 1), lambda b: (b, 0, 0)),
        compiler_params=pltpu.CompilerParams(
            dimension_semantics=("parallel",)),
    )(pT, patch_wT, vecs, qkvwT, owT, fc1T, fc2T, projT)
    return out[:, :, 0]


def _reference(x_nchw, params):
    """Pure-JAX reference (mirrors the original module semantics)."""
    B = x_nchw.shape[0]
    p = x_nchw.reshape(B, CHANNELS, GRID, PATCH, GRID, PATCH)
    p = p.transpose(0, 2, 4, 1, 3, 5).reshape(B, NUM_PATCHES, PATCH_DIM)
    emb = jnp.einsum('bpd,dh->bph', p, params['patch_w'])
    cls = jnp.broadcast_to(params['class_emb'], (B, 1, HIDDEN))
    x = jnp.concatenate([cls, emb], axis=1) + params['pos_emb'][None]

    def ln(z, w, b):
        mu = jnp.mean(z, axis=-1, keepdims=True)
        var = jnp.mean(jnp.square(z - mu), axis=-1, keepdims=True)
        return (z - mu) * jax.lax.rsqrt(var + EPS) * w + b

    x = ln(x, params['pre_ln_w'][0], params['pre_ln_b'][0])
    for l in range(LAYERS):
        res = x
        h = ln(x, params['ln1_w'][l], params['ln1_b'][l])
        q = (h @ params['qw'][l] + params['qb'][l]).reshape(
            B, SEQ, NUM_HEADS, HEAD_DIM) * ATTN_SCALE
        k = (h @ params['kw'][l] + params['kb'][l]).reshape(
            B, SEQ, NUM_HEADS, HEAD_DIM)
        v = (h @ params['vw'][l] + params['vb'][l]).reshape(
            B, SEQ, NUM_HEADS, HEAD_DIM)
        s = jnp.einsum('bqhd,bkhd->bhqk', q, k)
        pa = jax.nn.softmax(s, axis=-1)
        ctx = jnp.einsum('bhqk,bkhd->bqhd', pa, v).reshape(B, SEQ, HIDDEN)
        x = res + ctx @ params['ow'][l] + params['ob'][l]
        res = x
        h = ln(x, params['ln2_w'][l], params['ln2_b'][l])
        m = h @ params['fc1_w'][l] + params['fc1_b'][l]
        m = m * jax.nn.sigmoid(1.702 * m)
        x = res + m @ params['fc2_w'][l] + params['fc2_b'][l]
    pooled = ln(x[:, 0, :], params['post_ln_w'][0], params['post_ln_b'][0])
    return pooled @ params['proj_w']


if __name__ == "__main__":
    key = jax.random.PRNGKey(0)
    k_param, k_x = jax.random.split(key)
    params = init_params(k_param)
    x = jax.random.normal(
        k_x, (BATCH, CHANNELS, IMAGE, IMAGE), dtype=jnp.float32)  # NCHW
    image_embeds = image_encoder(x, params)
    jax.block_until_ready(image_embeds)
    assert image_embeds.shape == (BATCH, PROJ)
    ref = _reference(x, params)
    # approx-reciprocal (EUP) softmax/sigmoid -> allow ~1e-3-level deviation
    assert jnp.allclose(image_embeds, ref, atol=1e-2, rtol=1e-1), (
        float(jnp.max(jnp.abs(image_embeds - ref))))
    print("KERNEL_OK")
</pallas_src>

<mosaic_0001>
module attributes {stable_mosaic.version = 11 : i64} {
  func.func @clip_vision_kernel(%arg0: i32, %arg1: memref<1x192x5xf32, #tpu.memory_space<vmem>>, %arg2: memref<32x192xf32, #tpu.memory_space<vmem>>, %arg3: memref<96x25xf32, #tpu.memory_space<vmem>>, %arg4: memref<2x96x32xf32, #tpu.memory_space<vmem>>, %arg5: memref<2x32x32xf32, #tpu.memory_space<vmem>>, %arg6: memref<2x64x32xf32, #tpu.memory_space<vmem>>, %arg7: memref<2x32x64xf32, #tpu.memory_space<vmem>>, %arg8: memref<16x32xf32, #tpu.memory_space<vmem>>, %arg9: memref<1x16x1xf32, #tpu.memory_space<vmem>>) attributes {dimension_semantics = [#tpu.dimension_semantics<parallel>], iteration_bounds = array<i64: 2>, scalar_prefetch = 0 : i64, scratch_operands = 0 : i64, tpu.core_type = #tpu.core_type<tc>, window_params = [{transform_indices = @transform_0, window_bounds = array<i64: 1, 192, 5>}, {pipeline_mode = #tpu.pipeline_mode<synchronous>, transform_indices = @transform_1, window_bounds = array<i64: 32, 192>}, {pipeline_mode = #tpu.pipeline_mode<synchronous>, transform_indices = @transform_2, window_bounds = array<i64: 96, 25>}, {pipeline_mode = #tpu.pipeline_mode<synchronous>, transform_indices = @transform_3, window_bounds = array<i64: 2, 96, 32>}, {pipeline_mode = #tpu.pipeline_mode<synchronous>, transform_indices = @transform_4, window_bounds = array<i64: 2, 32, 32>}, {pipeline_mode = #tpu.pipeline_mode<synchronous>, transform_indices = @transform_5, window_bounds = array<i64: 2, 64, 32>}, {pipeline_mode = #tpu.pipeline_mode<synchronous>, transform_indices = @transform_6, window_bounds = array<i64: 2, 32, 64>}, {pipeline_mode = #tpu.pipeline_mode<synchronous>, transform_indices = @transform_7, window_bounds = array<i64: 16, 32>}, {transform_indices = @transform_8, window_bounds = array<i64: 1, 16, 1>}]} {
    %c0 = arith.constant 0 : index
    %c0_0 = arith.constant 0 : index
    %c0_1 = arith.constant 0 : index
    %0 = vector.load %arg1[%c0, %c0_0, %c0_1] : memref<1x192x5xf32, #tpu.memory_space<vmem>>, vector<1x192x5xf32>
    %1 = vector.shape_cast %0 : vector<1x192x5xf32> to vector<192x5xf32>
    %c0_2 = arith.constant 0 : index
    %c0_3 = arith.constant 0 : index
    %2 = vector.load %arg2[%c0_2, %c0_3] : memref<32x192xf32, #tpu.memory_space<vmem>>, vector<32x192xf32>
    %cst = arith.constant dense<0.000000e+00> : vector<32x5xf32>
    %3 = tpu.matmul %2, %1, %cst {dimension_numbers = #tpu.dot_dimension_numbers<[1], [0], [0], [1], [0, 0, 1, 1], [], []>} : vector<32x192xf32>, vector<192x5xf32>, vector<32x5xf32> -> vector<32x5xf32>
    %c0_4 = arith.constant 0 : index
    %c4 = arith.constant 4 : index
    %4 = vector.load %arg3[%c0_4, %c4] : memref<96x25xf32, #tpu.memory_space<vmem>>, vector<32x5xf32>
    %5 = arith.addf %3, %4 : vector<32x5xf32>
    %c0_5 = arith.constant 0 : index
    %c0_6 = arith.constant 0 : index
    %6 = vector.load %arg3[%c0_5, %c0_6] : memref<96x25xf32, #tpu.memory_space<vmem>>, vector<32x1xf32>
    %c0_7 = arith.constant 0 : index
    %c1 = arith.constant 1 : index
    %7 = vector.load %arg3[%c0_7, %c1] : memref<96x25xf32, #tpu.memory_space<vmem>>, vector<32x1xf32>
    %cst_8 = arith.constant dense<0.000000e+00> : vector<5xf32>
    %8 = vector.multi_reduction <add>, %5, %cst_8 [0] : vector<32x5xf32> to vector<5xf32>
    %9 = vector.shape_cast %8 : vector<5xf32> to vector<1x5xf32>
    %cst_9 = arith.constant 3.200000e+01 : f32
    %10 = vector.broadcast %cst_9 : f32 to vector<1x5xf32>
    %11 = arith.divf %9, %10 : vector<1x5xf32>
    %12 = vector.broadcast %11 : vector<1x5xf32> to vector<32x5xf32>
    %13 = arith.subf %5, %12 : vector<32x5xf32>
    %14 = arith.mulf %13, %13 : vector<32x5xf32>
    %cst_10 = arith.constant dense<0.000000e+00> : vector<5xf32>
    %15 = vector.multi_reduction <add>, %14, %cst_10 [0] : vector<32x5xf32> to vector<5xf32>
    %16 = vector.shape_cast %15 : vector<5xf32> to vector<1x5xf32>
    %cst_11 = arith.constant 3.200000e+01 : f32
    %17 = vector.broadcast %cst_11 : f32 to vector<1x5xf32>
    %18 = arith.divf %16, %17 : vector<1x5xf32>
    %19 = vector.broadcast %11 : vector<1x5xf32> to vector<32x5xf32>
    %20 = arith.subf %5, %19 : vector<32x5xf32>
    %cst_12 = arith.constant 9.99999974E-6 : f32
    %21 = vector.broadcast %cst_12 : f32 to vector<1x5xf32>
    %22 = arith.addf %18, %21 : vector<1x5xf32>
    %23 = math.rsqrt %22 : vector<1x5xf32>
    %24 = vector.broadcast %23 : vector<1x5xf32> to vector<32x5xf32>
    %25 = arith.mulf %20, %24 : vector<32x5xf32>
    %26 = vector.broadcast %6 : vector<32x1xf32> to vector<32x5xf32>
    %27 = arith.mulf %25, %26 : vector<32x5xf32>
    %28 = vector.broadcast %7 : vector<32x1xf32> to vector<32x5xf32>
    %29 = arith.addf %27, %28 : vector<32x5xf32>
    %c0_13 = arith.constant 0 : index
    %c9 = arith.constant 9 : index
    %30 = vector.load %arg3[%c0_13, %c9] : memref<96x25xf32, #tpu.memory_space<vmem>>, vector<32x1xf32>
    %c0_14 = arith.constant 0 : index
    %c10 = arith.constant 10 : index
    %31 = vector.load %arg3[%c0_14, %c10] : memref<96x25xf32, #tpu.memory_space<vmem>>, vector<32x1xf32>
    %cst_15 = arith.constant dense<0.000000e+00> : vector<5xf32>
    %32 = vector.multi_reduction <add>, %29, %cst_15 [0] : vector<32x5xf32> to vector<5xf32>
    %33 = vector.shape_cast %32 : vector<5xf32> to vector<1x5xf32>
    %cst_16 = arith.constant 3.200000e+01 : f32
    %34 = vector.broadcast %cst_16 : f32 to vector<1x5xf32>
    %35 = arith.divf %33, %34 : vector<1x5xf32>
    %36 = vector.broadcast %35 : vector<1x5xf32> to vector<32x5xf32>
    %37 = arith.subf %29, %36 : vector<32x5xf32>
    %38 = arith.mulf %37, %37 : vector<32x5xf32>
    %cst_17 = arith.constant dense<0.000000e+00> : vector<5xf32>
    %39 = vector.multi_reduction <add>, %38, %cst_17 [0] : vector<32x5xf32> to vector<5xf32>
    %40 = vector.shape_cast %39 : vector<5xf32> to vector<1x5xf32>
    %cst_18 = arith.constant 3.200000e+01 : f32
    %41 = vector.broadcast %cst_18 : f32 to vector<1x5xf32>
    %42 = arith.divf %40, %41 : vector<1x5xf32>
    %43 = vector.broadcast %35 : vector<1x5xf32> to vector<32x5xf32>
    %44 = arith.subf %29, %43 : vector<32x5xf32>
    %cst_19 = arith.constant 9.99999974E-6 : f32
    %45 = vector.broadcast %cst_19 : f32 to vector<1x5xf32>
    %46 = arith.addf %42, %45 : vector<1x5xf32>
    %47 = math.rsqrt %46 : vector<1x5xf32>
    %48 = vector.broadcast %47 : vector<1x5xf32> to vector<32x5xf32>
    %49 = arith.mulf %44, %48 : vector<32x5xf32>
    %50 = vector.broadcast %30 : vector<32x1xf32> to vector<32x5xf32>
    %51 = arith.mulf %49, %50 : vector<32x5xf32>
    %52 = vector.broadcast %31 : vector<32x1xf32> to vector<32x5xf32>
    %53 = arith.addf %51, %52 : vector<32x5xf32>
    %c0_20 = arith.constant 0 : index
    %c0_21 = arith.constant 0 : index
    %c0_22 = arith.constant 0 : index
    %54 = vector.load %arg4[%c0_20, %c0_21, %c0_22] : memref<2x96x32xf32, #tpu.memory_space<vmem>>, vector<1x96x32xf32>
    %55 = vector.shape_cast %54 : vector<1x96x32xf32> to vector<96x32xf32>
    %cst_23 = arith.constant dense<0.000000e+00> : vector<96x5xf32>
    %56 = tpu.matmul %55, %53, %cst_23 {dimension_numbers = #tpu.dot_dimension_numbers<[1], [0], [0], [1], [0, 0, 1, 1], [], []>} : vector<96x32xf32>, vector<32x5xf32>, vector<96x5xf32> -> vector<96x5xf32>
    %c0_24 = arith.constant 0 : index
    %c11 = arith.constant 11 : index
    %57 = vector.load %arg3[%c0_24, %c11] : memref<96x25xf32, #tpu.memory_space<vmem>>, vector<96x1xf32>
    %58 = vector.broadcast %57 : vector<96x1xf32> to vector<96x5xf32>
    %59 = arith.addf %56, %58 : vector<96x5xf32>
    %60 = vector.shape_cast %59 : vector<96x5xf32> to vector<12x8x5xf32>
    %61 = vector.extract_strided_slice %60 {offsets = [0, 0, 0], sizes = [4, 8, 5], strides = [1, 1, 1]} : vector<12x8x5xf32> to vector<4x8x5xf32>
    %62 = tpu.transpose %61, [0, 2, 1] : vector<4x8x5xf32> -> vector<4x5x8xf32>
    %63 = vector.extract_strided_slice %60 {offsets = [4, 0, 0], sizes = [4, 8, 5], strides = [1, 1, 1]} : vector<12x8x5xf32> to vector<4x8x5xf32>
    %64 = tpu.transpose %63, [0, 2, 1] : vector<4x8x5xf32> -> vector<4x5x8xf32>
    %65 = vector.extract_strided_slice %60 {offsets = [8, 0, 0], sizes = [4, 8, 5], strides = [1, 1, 1]} : vector<12x8x5xf32> to vector<4x8x5xf32>
    "tpu.trace_start"() <{level = 10 : i32, message = "hqd,hkd->hqk"}> : () -> ()
    %cst_25 = arith.constant dense<0.000000e+00> : vector<4x5x5xf32>
    %66 = tpu.matmul %62, %64, %cst_25 {dimension_numbers = #tpu.dot_dimension_numbers<[2], [2], [1], [1], [0, 0, 0, 1, 1, 1], [0], [0]>} : vector<4x5x8xf32>, vector<4x5x8xf32>, vector<4x5x5xf32> -> vector<4x5x5xf32>
    "tpu.trace_stop"() : () -> ()
    %cst_26 = arith.constant dense<0xFF800000> : vector<4x5xf32>
    %67 = vector.multi_reduction <maximumf>, %66, %cst_26 [2] : vector<4x5x5xf32> to vector<4x5xf32>
    %68 = vector.shape_cast %67 : vector<4x5xf32> to vector<4x5x1xf32>
    %69 = vector.broadcast %68 : vector<4x5x1xf32> to vector<4x5x5xf32>
    %70 = arith.subf %66, %69 : vector<4x5x5xf32>
    %71 = math.exp %70 : vector<4x5x5xf32>
    %cst_27 = arith.constant dense<0.000000e+00> : vector<4x5xf32>
    %72 = vector.multi_reduction <add>, %71, %cst_27 [2] : vector<4x5x5xf32> to vector<4x5xf32>
    %73 = vector.shape_cast %72 : vector<4x5xf32> to vector<4x5x1xf32>
    %74 = tpu.reciprocal %73 {approx = true} : vector<4x5x1xf32> -> vector<4x5x1xf32>
    %75 = vector.broadcast %74 : vector<4x5x1xf32> to vector<4x5x5xf32>
    %76 = arith.mulf %71, %75 : vector<4x5x5xf32>
    "tpu.trace_start"() <{level = 10 : i32, message = "hdk,hqk->hdq"}> : () -> ()
    %cst_28 = arith.constant dense<0.000000e+00> : vector<4x8x5xf32>
    %77 = tpu.matmul %65, %76, %cst_28 {dimension_numbers = #tpu.dot_dimension_numbers<[2], [2], [1], [1], [0, 0, 0, 1, 1, 1], [0], [0]>} : vector<4x8x5xf32>, vector<4x5x5xf32>, vector<4x8x5xf32> -> vector<4x8x5xf32>
    "tpu.trace_stop"() : () -> ()
    %c0_29 = arith.constant 0 : index
    %c0_30 = arith.constant 0 : index
    %c0_31 = arith.constant 0 : index
    %78 = vector.load %arg5[%c0_29, %c0_30, %c0_31] : memref<2x32x32xf32, #tpu.memory_space<vmem>>, vector<1x32x32xf32>
    %79 = vector.shape_cast %78 : vector<1x32x32xf32> to vector<32x32xf32>
    %80 = vector.shape_cast %77 : vector<4x8x5xf32> to vector<32x5xf32>
    %cst_32 = arith.constant dense<0.000000e+00> : vector<32x5xf32>
    %81 = tpu.matmul %79, %80, %cst_32 {dimension_numbers = #tpu.dot_dimension_numbers<[1], [0], [0], [1], [0, 0, 1, 1], [], []>} : vector<32x32xf32>, vector<32x5xf32>, vector<32x5xf32> -> vector<32x5xf32>
    %c0_33 = arith.constant 0 : index
    %c12 = arith.constant 12 : index
    %82 = vector.load %arg3[%c0_33, %c12] : memref<96x25xf32, #tpu.memory_space<vmem>>, vector<32x1xf32>
    %83 = vector.broadcast %82 : vector<32x1xf32> to vector<32x5xf32>
    %84 = arith.addf %81, %83 : vector<32x5xf32>
    %85 = arith.addf %29, %84 : vector<32x5xf32>
    %c0_34 = arith.constant 0 : index
    %c13 = arith.constant 13 : index
    %86 = vector.load %arg3[%c0_34, %c13] : memref<96x25xf32, #tpu.memory_space<vmem>>, vector<32x1xf32>
    %c0_35 = arith.constant 0 : index
    %c14 = arith.constant 14 : index
    %87 = vector.load %arg3[%c0_35, %c14] : memref<96x25xf32, #tpu.memory_space<vmem>>, vector<32x1xf32>
    %cst_36 = arith.constant dense<0.000000e+00> : vector<5xf32>
    %88 = vector.multi_reduction <add>, %85, %cst_36 [0] : vector<32x5xf32> to vector<5xf32>
    %89 = vector.shape_cast %88 : vector<5xf32> to vector<1x5xf32>
    %cst_37 = arith.constant 3.200000e+01 : f32
    %90 = vector.broadcast %cst_37 : f32 to vector<1x5xf32>
    %91 = arith.divf %89, %90 : vector<1x5xf32>
    %92 = vector.broadcast %91 : vector<1x5xf32> to vector<32x5xf32>
    %93 = arith.subf %85, %92 : vector<32x5xf32>
    %94 = arith.mulf %93, %93 : vector<32x5xf32>
    %cst_38 = arith.constant dense<0.000000e+00> : vector<5xf32>
    %95 = vector.multi_reduction <add>, %94, %cst_38 [0] : vector<32x5xf32> to vector<5xf32>
    %96 = vector.shape_cast %95 : vector<5xf32> to vector<1x5xf32>
    %cst_39 = arith.constant 3.200000e+01 : f32
    %97 = vector.broadcast %cst_39 : f32 to vector<1x5xf32>
    %98 = arith.divf %96, %97 : vector<1x5xf32>
    %99 = vector.broadcast %91 : vector<1x5xf32> to vector<32x5xf32>
    %100 = arith.subf %85, %99 : vector<32x5xf32>
    %cst_40 = arith.constant 9.99999974E-6 : f32
    %101 = vector.broadcast %cst_40 : f32 to vector<1x5xf32>
    %102 = arith.addf %98, %101 : vector<1x5xf32>
    %103 = math.rsqrt %102 : vector<1x5xf32>
    %104 = vector.broadcast %103 : vector<1x5xf32> to vector<32x5xf32>
    %105 = arith.mulf %100, %104 : vector<32x5xf32>
    %106 = vector.broadcast %86 : vector<32x1xf32> to vector<32x5xf32>
    %107 = arith.mulf %105, %106 : vector<32x5xf32>
    %108 = vector.broadcast %87 : vector<32x1xf32> to vector<32x5xf32>
    %109 = arith.addf %107, %108 : vector<32x5xf32>
    %c0_41 = arith.constant 0 : index
    %c0_42 = arith.constant 0 : index
    %c0_43 = arith.constant 0 : index
    %110 = vector.load %arg6[%c0_41, %c0_42, %c0_43] : memref<2x64x32xf32, #tpu.memory_space<vmem>>, vector<1x64x32xf32>
    %111 = vector.shape_cast %110 : vector<1x64x32xf32> to vector<64x32xf32>
    %cst_44 = arith.constant dense<0.000000e+00> : vector<64x5xf32>
    %112 = tpu.matmul %111, %109, %cst_44 {dimension_numbers = #tpu.dot_dimension_numbers<[1], [0], [0], [1], [0, 0, 1, 1], [], []>} : vector<64x32xf32>, vector<32x5xf32>, vector<64x5xf32> -> vector<64x5xf32>
    %c0_45 = arith.constant 0 : index
    %c15 = arith.constant 15 : index
    %113 = vector.load %arg3[%c0_45, %c15] : memref<96x25xf32, #tpu.memory_space<vmem>>, vector<64x1xf32>
    %114 = vector.broadcast %113 : vector<64x1xf32> to vector<64x5xf32>
    %115 = arith.addf %112, %114 : vector<64x5xf32>
    %cst_46 = arith.constant -1.702000e+00 : f32
    %116 = vector.broadcast %cst_46 : f32 to vector<64x5xf32>
    %117 = arith.mulf %116, %115 : vector<64x5xf32>
    %118 = math.exp %117 : vector<64x5xf32>
    %cst_47 = arith.constant 1.000000e+00 : f32
    %119 = vector.broadcast %cst_47 : f32 to vector<64x5xf32>
    %120 = arith.addf %119, %118 : vector<64x5xf32>
    %121 = tpu.reciprocal %120 {approx = true} : vector<64x5xf32> -> vector<64x5xf32>
    %122 = arith.mulf %115, %121 : vector<64x5xf32>
    %c0_48 = arith.constant 0 : index
    %c0_49 = arith.constant 0 : index
    %c0_50 = arith.constant 0 : index
    %123 = vector.load %arg7[%c0_48, %c0_49, %c0_50] : memref<2x32x64xf32, #tpu.memory_space<vmem>>, vector<1x32x64xf32>
    %124 = vector.shape_cast %123 : vector<1x32x64xf32> to vector<32x64xf32>
    %cst_51 = arith.constant dense<0.000000e+00> : vector<32x5xf32>
    %125 = tpu.matmul %124, %122, %cst_51 {dimension_numbers = #tpu.dot_dimension_numbers<[1], [0], [0], [1], [0, 0, 1, 1], [], []>} : vector<32x64xf32>, vector<64x5xf32>, vector<32x5xf32> -> vector<32x5xf32>
    %126 = arith.addf %85, %125 : vector<32x5xf32>
    %c0_52 = arith.constant 0 : index
    %c16 = arith.constant 16 : index
    %127 = vector.load %arg3[%c0_52, %c16] : memref<96x25xf32, #tpu.memory_space<vmem>>, vector<32x1xf32>
    %128 = vector.broadcast %127 : vector<32x1xf32> to vector<32x5xf32>
    %129 = arith.addf %126, %128 : vector<32x5xf32>
    %c0_53 = arith.constant 0 : index
    %c17 = arith.constant 17 : index
    %130 = vector.load %arg3[%c0_53, %c17] : memref<96x25xf32, #tpu.memory_space<vmem>>, vector<32x1xf32>
    %c0_54 = arith.constant 0 : index
    %c18 = arith.constant 18 : index
    %131 = vector.load %arg3[%c0_54, %c18] : memref<96x25xf32, #tpu.memory_space<vmem>>, vector<32x1xf32>
    %cst_55 = arith.constant dense<0.000000e+00> : vector<5xf32>
    %132 = vector.multi_reduction <add>, %129, %cst_55 [0] : vector<32x5xf32> to vector<5xf32>
    %133 = vector.shape_cast %132 : vector<5xf32> to vector<1x5xf32>
    %cst_56 = arith.constant 3.200000e+01 : f32
    %134 = vector.broadcast %cst_56 : f32 to vector<1x5xf32>
    %135 = arith.divf %133, %134 : vector<1x5xf32>
    %136 = vector.broadcast %135 : vector<1x5xf32> to vector<32x5xf32>
    %137 = arith.subf %129, %136 : vector<32x5xf32>
    %138 = arith.mulf %137, %137 : vector<32x5xf32>
    %cst_57 = arith.constant dense<0.000000e+00> : vector<5xf32>
    %139 = vector.multi_reduction <add>, %138, %cst_57 [0] : vector<32x5xf32> to vector<5xf32>
    %140 = vector.shape_cast %139 : vector<5xf32> to vector<1x5xf32>
    %cst_58 = arith.constant 3.200000e+01 : f32
    %141 = vector.broadcast %cst_58 : f32 to vector<1x5xf32>
    %142 = arith.divf %140, %141 : vector<1x5xf32>
    %143 = vector.broadcast %135 : vector<1x5xf32> to vector<32x5xf32>
    %144 = arith.subf %129, %143 : vector<32x5xf32>
    %cst_59 = arith.constant 9.99999974E-6 : f32
    %145 = vector.broadcast %cst_59 : f32 to vector<1x5xf32>
    %146 = arith.addf %142, %145 : vector<1x5xf32>
    %147 = math.rsqrt %146 : vector<1x5xf32>
    %148 = vector.broadcast %147 : vector<1x5xf32> to vector<32x5xf32>
    %149 = arith.mulf %144, %148 : vector<32x5xf32>
    %150 = vector.broadcast %130 : vector<32x1xf32> to vector<32x5xf32>
    %151 = arith.mulf %149, %150 : vector<32x5xf32>
    %152 = vector.broadcast %131 : vector<32x1xf32> to vector<32x5xf32>
    %153 = arith.addf %151, %152 : vector<32x5xf32>
    %c1_60 = arith.constant 1 : index
    %c0_61 = arith.constant 0 : index
    %c0_62 = arith.constant 0 : index
    %154 = vector.load %arg4[%c1_60, %c0_61, %c0_62] : memref<2x96x32xf32, #tpu.memory_space<vmem>>, vector<1x96x32xf32>
    %155 = vector.shape_cast %154 : vector<1x96x32xf32> to vector<96x32xf32>
    %cst_63 = arith.constant dense<0.000000e+00> : vector<96x5xf32>
    %156 = tpu.matmul %155, %153, %cst_63 {dimension_numbers = #tpu.dot_dimension_numbers<[1], [0], [0], [1], [0, 0, 1, 1], [], []>} : vector<96x32xf32>, vector<32x5xf32>, vector<96x5xf32> -> vector<96x5xf32>
    %c0_64 = arith.constant 0 : index
    %c19 = arith.constant 19 : index
    %157 = vector.load %arg3[%c0_64, %c19] : memref<96x25xf32, #tpu.memory_space<vmem>>, vector<96x1xf32>
    %158 = vector.broadcast %157 : vector<96x1xf32> to vector<96x5xf32>
    %159 = arith.addf %156, %158 : vector<96x5xf32>
    %160 = vector.shape_cast %159 : vector<96x5xf32> to vector<12x8x5xf32>
    %161 = vector.extract_strided_slice %160 {offsets = [0, 0, 0], sizes = [4, 8, 5], strides = [1, 1, 1]} : vector<12x8x5xf32> to vector<4x8x5xf32>
    %162 = tpu.transpose %161, [0, 2, 1] : vector<4x8x5xf32> -> vector<4x5x8xf32>
    %163 = vector.extract_strided_slice %160 {offsets = [4, 0, 0], sizes = [4, 8, 5], strides = [1, 1, 1]} : vector<12x8x5xf32> to vector<4x8x5xf32>
    %164 = tpu.transpose %163, [0, 2, 1] : vector<4x8x5xf32> -> vector<4x5x8xf32>
    %165 = vector.extract_strided_slice %160 {offsets = [8, 0, 0], sizes = [4, 8, 5], strides = [1, 1, 1]} : vector<12x8x5xf32> to vector<4x8x5xf32>
    "tpu.trace_start"() <{level = 10 : i32, message = "hqd,hkd->hqk"}> : () -> ()
    %cst_65 = arith.constant dense<0.000000e+00> : vector<4x5x5xf32>
    %166 = tpu.matmul %162, %164, %cst_65 {dimension_numbers = #tpu.dot_dimension_numbers<[2], [2], [1], [1], [0, 0, 0, 1, 1, 1], [0], [0]>} : vector<4x5x8xf32>, vector<4x5x8xf32>, vector<4x5x5xf32> -> vector<4x5x5xf32>
    "tpu.trace_stop"() : () -> ()
    %cst_66 = arith.constant dense<0xFF800000> : vector<4x5xf32>
    %167 = vector.multi_reduction <maximumf>, %166, %cst_66 [2] : vector<4x5x5xf32> to vector<4x5xf32>
    %168 = vector.shape_cast %167 : vector<4x5xf32> to vector<4x5x1xf32>
    %169 = vector.broadcast %168 : vector<4x5x1xf32> to vector<4x5x5xf32>
    %170 = arith.subf %166, %169 : vector<4x5x5xf32>
    %171 = math.exp %170 : vector<4x5x5xf32>
    %cst_67 = arith.constant dense<0.000000e+00> : vector<4x5xf32>
    %172 = vector.multi_reduction <add>, %171, %cst_67 [2] : vector<4x5x5xf32> to vector<4x5xf32>
    %173 = vector.shape_cast %172 : vector<4x5xf32> to vector<4x5x1xf32>
    %174 = tpu.reciprocal %173 {approx = true} : vector<4x5x1xf32> -> vector<4x5x1xf32>
    %175 = vector.broadcast %174 : vector<4x5x1xf32> to vector<4x5x5xf32>
    %176 = arith.mulf %171, %175 : vector<4x5x5xf32>
    "tpu.trace_start"() <{level = 10 : i32, message = "hdk,hqk->hdq"}> : () -> ()
    %cst_68 = arith.constant dense<0.000000e+00> : vector<4x8x5xf32>
    %177 = tpu.matmul %165, %176, %cst_68 {dimension_numbers = #tpu.dot_dimension_numbers<[2], [2], [1], [1], [0, 0, 0, 1, 1, 1], [0], [0]>} : vector<4x8x5xf32>, vector<4x5x5xf32>, vector<4x8x5xf32> -> vector<4x8x5xf32>
    "tpu.trace_stop"() : () -> ()
    %c1_69 = arith.constant 1 : index
    %c0_70 = arith.constant 0 : index
    %c0_71 = arith.constant 0 : index
    %178 = vector.load %arg5[%c1_69, %c0_70, %c0_71] : memref<2x32x32xf32, #tpu.memory_space<vmem>>, vector<1x32x32xf32>
    %179 = vector.shape_cast %178 : vector<1x32x32xf32> to vector<32x32xf32>
    %180 = vector.shape_cast %177 : vector<4x8x5xf32> to vector<32x5xf32>
    %cst_72 = arith.constant dense<0.000000e+00> : vector<32x5xf32>
    %181 = tpu.matmul %179, %180, %cst_72 {dimension_numbers = #tpu.dot_dimension_numbers<[1], [0], [0], [1], [0, 0, 1, 1], [], []>} : vector<32x32xf32>, vector<32x5xf32>, vector<32x5xf32> -> vector<32x5xf32>
    %c0_73 = arith.constant 0 : index
    %c20 = arith.constant 20 : index
    %182 = vector.load %arg3[%c0_73, %c20] : memref<96x25xf32, #tpu.memory_space<vmem>>, vector<32x1xf32>
    %183 = vector.broadcast %182 : vector<32x1xf32> to vector<32x5xf32>
    %184 = arith.addf %181, %183 : vector<32x5xf32>
    %185 = arith.addf %129, %184 : vector<32x5xf32>
    %c0_74 = arith.constant 0 : index
    %c21 = arith.constant 21 : index
    %186 = vector.load %arg3[%c0_74, %c21] : memref<96x25xf32, #tpu.memory_space<vmem>>, vector<32x1xf32>
    %c0_75 = arith.constant 0 : index
    %c22 = arith.constant 22 : index
    %187 = vector.load %arg3[%c0_75, %c22] : memref<96x25xf32, #tpu.memory_space<vmem>>, vector<32x1xf32>
    %cst_76 = arith.constant dense<0.000000e+00> : vector<5xf32>
    %188 = vector.multi_reduction <add>, %185, %cst_76 [0] : vector<32x5xf32> to vector<5xf32>
    %189 = vector.shape_cast %188 : vector<5xf32> to vector<1x5xf32>
    %cst_77 = arith.constant 3.200000e+01 : f32
    %190 = vector.broadcast %cst_77 : f32 to vector<1x5xf32>
    %191 = arith.divf %189, %190 : vector<1x5xf32>
    %192 = vector.broadcast %191 : vector<1x5xf32> to vector<32x5xf32>
    %193 = arith.subf %185, %192 : vector<32x5xf32>
    %194 = arith.mulf %193, %193 : vector<32x5xf32>
    %cst_78 = arith.constant dense<0.000000e+00> : vector<5xf32>
    %195 = vector.multi_reduction <add>, %194, %cst_78 [0] : vector<32x5xf32> to vector<5xf32>
    %196 = vector.shape_cast %195 : vector<5xf32> to vector<1x5xf32>
    %cst_79 = arith.constant 3.200000e+01 : f32
    %197 = vector.broadcast %cst_79 : f32 to vector<1x5xf32>
    %198 = arith.divf %196, %197 : vector<1x5xf32>
    %199 = vector.broadcast %191 : vector<1x5xf32> to vector<32x5xf32>
    %200 = arith.subf %185, %199 : vector<32x5xf32>
    %cst_80 = arith.constant 9.99999974E-6 : f32
    %201 = vector.broadcast %cst_80 : f32 to vector<1x5xf32>
    %202 = arith.addf %198, %201 : vector<1x5xf32>
    %203 = math.rsqrt %202 : vector<1x5xf32>
    %204 = vector.broadcast %203 : vector<1x5xf32> to vector<32x5xf32>
    %205 = arith.mulf %200, %204 : vector<32x5xf32>
    %206 = vector.broadcast %186 : vector<32x1xf32> to vector<32x5xf32>
    %207 = arith.mulf %205, %206 : vector<32x5xf32>
    %208 = vector.broadcast %187 : vector<32x1xf32> to vector<32x5xf32>
    %209 = arith.addf %207, %208 : vector<32x5xf32>
    %c1_81 = arith.constant 1 : index
    %c0_82 = arith.constant 0 : index
    %c0_83 = arith.constant 0 : index
    %210 = vector.load %arg6[%c1_81, %c0_82, %c0_83] : memref<2x64x32xf32, #tpu.memory_space<vmem>>, vector<1x64x32xf32>
    %211 = vector.shape_cast %210 : vector<1x64x32xf32> to vector<64x32xf32>
    %cst_84 = arith.constant dense<0.000000e+00> : vector<64x5xf32>
    %212 = tpu.matmul %211, %209, %cst_84 {dimension_numbers = #tpu.dot_dimension_numbers<[1], [0], [0], [1], [0, 0, 1, 1], [], []>} : vector<64x32xf32>, vector<32x5xf32>, vector<64x5xf32> -> vector<64x5xf32>
    %c0_85 = arith.constant 0 : index
    %c23 = arith.constant 23 : index
    %213 = vector.load %arg3[%c0_85, %c23] : memref<96x25xf32, #tpu.memory_space<vmem>>, vector<64x1xf32>
    %214 = vector.broadcast %213 : vector<64x1xf32> to vector<64x5xf32>
    %215 = arith.addf %212, %214 : vector<64x5xf32>
    %cst_86 = arith.constant -1.702000e+00 : f32
    %216 = vector.broadcast %cst_86 : f32 to vector<64x5xf32>
    %217 = arith.mulf %216, %215 : vector<64x5xf32>
    %218 = math.exp %217 : vector<64x5xf32>
    %cst_87 = arith.constant 1.000000e+00 : f32
    %219 = vector.broadcast %cst_87 : f32 to vector<64x5xf32>
    %220 = arith.addf %219, %218 : vector<64x5xf32>
    %221 = tpu.reciprocal %220 {approx = true} : vector<64x5xf32> -> vector<64x5xf32>
    %222 = arith.mulf %215, %221 : vector<64x5xf32>
    %c1_88 = arith.constant 1 : index
    %c0_89 = arith.constant 0 : index
    %c0_90 = arith.constant 0 : index
    %223 = vector.load %arg7[%c1_88, %c0_89, %c0_90] : memref<2x32x64xf32, #tpu.memory_space<vmem>>, vector<1x32x64xf32>
    %224 = vector.shape_cast %223 : vector<1x32x64xf32> to vector<32x64xf32>
    %cst_91 = arith.constant dense<0.000000e+00> : vector<32x5xf32>
    %225 = tpu.matmul %224, %222, %cst_91 {dimension_numbers = #tpu.dot_dimension_numbers<[1], [0], [0], [1], [0, 0, 1, 1], [], []>} : vector<32x64xf32>, vector<64x5xf32>, vector<32x5xf32> -> vector<32x5xf32>
    %226 = arith.addf %185, %225 : vector<32x5xf32>
    %c0_92 = arith.constant 0 : index
    %c24 = arith.constant 24 : index
    %227 = vector.load %arg3[%c0_92, %c24] : memref<96x25xf32, #tpu.memory_space<vmem>>, vector<32x1xf32>
    %228 = vector.broadcast %227 : vector<32x1xf32> to vector<32x5xf32>
    %229 = arith.addf %226, %228 : vector<32x5xf32>
    %230 = vector.extract_strided_slice %229 {offsets = [0, 0], sizes = [32, 1], strides = [1, 1]} : vector<32x5xf32> to vector<32x1xf32>
    %c0_93 = arith.constant 0 : index
    %c2 = arith.constant 2 : index
    %231 = vector.load %arg3[%c0_93, %c2] : memref<96x25xf32, #tpu.memory_space<vmem>>, vector<32x1xf32>
    %c0_94 = arith.constant 0 : index
    %c3 = arith.constant 3 : index
    %232 = vector.load %arg3[%c0_94, %c3] : memref<96x25xf32, #tpu.memory_space<vmem>>, vector<32x1xf32>
    %cst_95 = arith.constant dense<0.000000e+00> : vector<1xf32>
    %233 = vector.multi_reduction <add>, %230, %cst_95 [0] : vector<32x1xf32> to vector<1xf32>
    %234 = vector.shape_cast %233 : vector<1xf32> to vector<1x1xf32>
    %cst_96 = arith.constant 3.200000e+01 : f32
    %235 = vector.broadcast %cst_96 : f32 to vector<1x1xf32>
    %236 = arith.divf %234, %235 : vector<1x1xf32>
    %237 = vector.broadcast %236 : vector<1x1xf32> to vector<32x1xf32>
    %238 = arith.subf %230, %237 : vector<32x1xf32>
    %239 = arith.mulf %238, %238 : vector<32x1xf32>
    %cst_97 = arith.constant dense<0.000000e+00> : vector<1xf32>
    %240 = vector.multi_reduction <add>, %239, %cst_97 [0] : vector<32x1xf32> to vector<1xf32>
    %241 = vector.shape_cast %240 : vector<1xf32> to vector<1x1xf32>
    %cst_98 = arith.constant 3.200000e+01 : f32
    %242 = vector.broadcast %cst_98 : f32 to vector<1x1xf32>
    %243 = arith.divf %241, %242 : vector<1x1xf32>
    %244 = vector.broadcast %236 : vector<1x1xf32> to vector<32x1xf32>
    %245 = arith.subf %230, %244 : vector<32x1xf32>
    %cst_99 = arith.constant 9.99999974E-6 : f32
    %246 = vector.broadcast %cst_99 : f32 to vector<1x1xf32>
    %247 = arith.addf %243, %246 : vector<1x1xf32>
    %248 = math.rsqrt %247 : vector<1x1xf32>
    %249 = vector.broadcast %248 : vector<1x1xf32> to vector<32x1xf32>
    %250 = arith.mulf %245, %249 : vector<32x1xf32>
    %251 = arith.mulf %250, %231 : vector<32x1xf32>
    %252 = arith.addf %251, %232 : vector<32x1xf32>
    %c0_100 = arith.constant 0 : index
    %c0_101 = arith.constant 0 : index
    %253 = vector.load %arg8[%c0_100, %c0_101] : memref<16x32xf32, #tpu.memory_space<vmem>>, vector<16x32xf32>
    %cst_102 = arith.constant dense<0.000000e+00> : vector<16x1xf32>
    %254 = tpu.matmul %253, %252, %cst_102 {dimension_numbers = #tpu.dot_dimension_numbers<[1], [0], [0], [1], [0, 0, 1, 1], [], []>} : vector<16x32xf32>, vector<32x1xf32>, vector<16x1xf32> -> vector<16x1xf32>
    %c0_103 = arith.constant 0 : index
    %c0_104 = arith.constant 0 : index
    %c0_105 = arith.constant 0 : index
    %255 = vector.load %arg9[%c0_103, %c0_104, %c0_105] : memref<1x16x1xf32, #tpu.memory_space<vmem>>, vector<1x16x1xf32>
    %256 = vector.shape_cast %255 : vector<1x16x1xf32> to vector<16x1xf32>
    %257 = vector.shape_cast %254 : vector<16x1xf32> to vector<1x16x1xf32>
    tpu.vector_store %arg9[%c0_103, %c0_104, %c0_105], %257 {strides = array<i32>} : memref<1x16x1xf32, #tpu.memory_space<vmem>>, vector<1x16x1xf32>,
    return
  }
  func.func @transform_0(%arg0: i32) -> (i32, i32, i32) {
    %c0_i32 = arith.constant 0 : i32
    %c0_i32_0 = arith.constant 0 : i32
    %c0_i32_1 = arith.constant 0 : i32
    return %arg0, %c0_i32, %c0_i32_0 : i32, i32, i32
  }
  func.func @transform_1(%arg0: i32) -> (i32, i32) {
    %c0_i32 = arith.constant 0 : i32
    %c0_i32_0 = arith.constant 0 : i32
    %c0_i32_1 = arith.constant 0 : i32
    return %c0_i32, %c0_i32_0 : i32, i32
  }
  func.func @transform_2(%arg0: i32) -> (i32, i32) {
    %c0_i32 = arith.constant 0 : i32
    %c0_i32_0 = arith.constant 0 : i32
    %c0_i32_1 = arith.constant 0 : i32
    return %c0_i32, %c0_i32_0 : i32, i32
  }
  func.func @transform_3(%arg0: i32) -> (i32, i32, i32) {
    %c0_i32 = arith.constant 0 : i32
    %c0_i32_0 = arith.constant 0 : i32
    %c0_i32_1 = arith.constant 0 : i32
    %c0_i32_2 = arith.constant 0 : i32
    return %c0_i32, %c0_i32_0, %c0_i32_1 : i32, i32, i32
  }
  func.func @transform_4(%arg0: i32) -> (i32, i32, i32) {
    %c0_i32 = arith.constant 0 : i32
    %c0_i32_0 = arith.constant 0 : i32
    %c0_i32_1 = arith.constant 0 : i32
    %c0_i32_2 = arith.constant 0 : i32
    return %c0_i32, %c0_i32_0, %c0_i32_1 : i32, i32, i32
  }
  func.func @transform_5(%arg0: i32) -> (i32, i32, i32) {
    %c0_i32 = arith.constant 0 : i32
    %c0_i32_0 = arith.constant 0 : i32
    %c0_i32_1 = arith.constant 0 : i32
    %c0_i32_2 = arith.constant 0 : i32
    return %c0_i32, %c0_i32_0, %c0_i32_1 : i32, i32, i32
  }
  func.func @transform_6(%arg0: i32) -> (i32, i32, i32) {
    %c0_i32 = arith.constant 0 : i32
    %c0_i32_0 = arith.constant 0 : i32
    %c0_i32_1 = arith.constant 0 : i32
    %c0_i32_2 = arith.constant 0 : i32
    return %c0_i32, %c0_i32_0, %c0_i32_1 : i32, i32, i32
  }
  func.func @transform_7(%arg0: i32) -> (i32, i32) {
    %c0_i32 = arith.constant 0 : i32
    %c0_i32_0 = arith.constant 0 : i32
    %c0_i32_1 = arith.constant 0 : i32
    return %c0_i32, %c0_i32_0 : i32, i32
  }
  func.func @transform_8(%arg0: i32) -> (i32, i32, i32) {
    %c0_i32 = arith.constant 0 : i32
    %c0_i32_0 = arith.constant 0 : i32
    %c0_i32_1 = arith.constant 0 : i32
    return %arg0, %c0_i32, %c0_i32_0 : i32, i32, i32
  }
}

</mosaic_0001>

<bundles_post_ra>
// kernel: image_encoder.1
= control target key start
LH: loop header
LB: loop body
LE: loop exit
PB: predicated region body
PF: predicated region fallthrough
CT: control target
= control target key end

     0   :  { %s3178_s27 = smov 0   ;;  %s3930_s0 = inlined_call_operand.vmem [shape: f32[2,192,5], index: 0, kind: input, shape index: {}]   ;;  %s3931_s1 = inlined_call_operand.vmem [shape: f32[32,192], index: 1, kind: input, shape index: {}]   ;;  %s3932_s2 = inlined_call_operand.vmem [shape: f32[96,25], index: 2, kind: input, shape index: {}]   ;;  %s3933_s3 = inlined_call_operand.vmem [shape: f32[2,96,32], index: 3, kind: input, shape index: {}]   ;;  %s3934_s4 = inlined_call_operand.vmem [shape: f32[2,32,32], index: 4, kind: input, shape index: {}]   ;;  %s3935_s5 = inlined_call_operand.vmem [shape: f32[2,64,32], index: 5, kind: input, shape index: {}]   ;;  %s3936_s6 = inlined_call_operand.vmem [shape: f32[2,32,64], index: 6, kind: input, shape index: {}]   ;;  %s3937_s7 = inlined_call_operand.vmem [shape: f32[16,32], index: 7, kind: input, shape index: {}]   ;;  %s3938_s8 = inlined_call_operand.vmem [shape: f32[2,16,1], index: 8, kind: output, shape index: {}]  }
   0x1 LB: > { %s2775_s28 = sadd.s32 4294967295, %s3109_s27   ;;  %p2779_p0 = scmp.ge.s32.totalorder %s3109_s27, 1  ;;  %s3109_s27 = sphi %s3178_s27, %s18_s27  }
   0x2   : > { %p262_p1 = scmp.lt.s32.totalorder %s3109_s27, 3 }
   0x4   : > { %p263_p2 = pnand %p2779_p0, %p262_p1 }
   0x5   : > { %p296_p3 = scmp.lt.s32.totalorder (!%p263_p2), %s2775_s28, 1  ;;  %s3111_s13 = smov (!%p263_p2), 124  }
   0x6   : > { %266 = sbr.rel (%p263_p2) target bundleno = 3575 (0xdf7), region = 52  ;;  %s3131_s18 = smov (!%p263_p2), 126  }
   0x7   : > { %s3132_s21 = smov (!%p263_p2), 125  }
   0xb   : > { %s3940_s28 = smov (!%p296_p3, %s2775_s28), 1  ;;  %v3208_v11 = vld [vmem:[%s3932_s2] sm:$0xff]  ;;  %v331_v19 = vld [vmem:[%s3931_s1 + $0x8] sm:$0xff]  ;;  %vm358_vm0 = vcmask 523264   ;;  %v333_v25 = vld [vmem:[%s3931_s1 + $0x18] sm:$0xff]  ;;  %v3112_v28 = vmov 1  }
   0xc   : > { %s2904_s29 = smul.u32 192, %s3940_s28  ;;  %346 = vrot.lane.b32.xlu0 %v3208_v11, %s3111_s13  ;;  %v3225_v20 = vld [vmem:[%s3932_s2 + $0x8] sm:$0xff]  ;;  %v3240_v26 = vld [vmem:[%s3932_s2 + $0x10] sm:$0xff]  ;;  %2938 = vset.pattern.permute.xlu1 %v3112_v28  ;;  %v3113_v29 = vmov 0   ;;  %v330_v31 = vld [vmem:[%s3931_s1] sm:$0xff]  ;;  %v3114_v38 = vmov 9  }
   0xd   : > { %350 = vrot.lane.b32.xlu1 %v3240_v26, %s3111_s13  ;;  %2937 = vset.pattern.permute.xlu0 %v3113_v29  ;;  %v3255_v32 = vld [vmem:[%s3932_s2 + $0x18] sm:$0xff]  ;;  %v335_v33 = vld [vmem:[%s3931_s1 + $0x28] sm:$0xff]  ;;  %v332_v34 = vld [vmem:[%s3931_s1 + $0x10] sm:$0xff]  ;;  %v3115_v41 = vmov 10   ;;  %v3116_v50 = vmov 32.0   ;;  %vm429_vm1 = vcmask 39936  }
   0xe   : > { %s3192_s10 = scalar_lea.vmem %s3930_s0, %s2904_s29  ;;  %2936 = vset.pattern.permute.xlu2 %v3113_v29  ;;  %v337_v35 = vld [vmem:[%s3931_s1 + $0x38] sm:$0xff]  ;;  %v334_v36 = vld [vmem:[%s3931_s1 + $0x20] sm:$0xff]  ;;  %v336_v37 = vld [vmem:[%s3931_s1 + $0x30] sm:$0xff]  ;;  %2985 = vrcp.f32 %v3116_v50  ;;  %vm703_vm9 = vcmask 261120   ;;  %vm921_vm10 = vcmask 64512   ;;  %vm1014_vm11 = vcmask 36864  }
   0xf   : > { %v321_v0 = vld [vmem:[%s3192_s10 + $0x78] sm:$0xff]  ;;  %v320_v1 = vld [vmem:[%s3192_s10 + $0x70] sm:$0xff]  ;;  %v319_v2 = vld [vmem:[%s3192_s10 + $0x68] sm:$0xff]  ;;  %489 = vperm.xlu2 %2936, %v3208_v11   ;;  %s2899_s12 = sshll.u32 %s3940_s28, 4 }
  0x10   : > { %371 = vmatpush.msra.mxu0 %v321_v0  ;;  %v329_v3 = vld [vmem:[%s3192_s10 + $0xb8] sm:$0xff]  ;;  %v318_v4 = vld [vmem:[%s3192_s10 + $0x60] sm:$0xff]  ;;  %v328_v5 = vld [vmem:[%s3192_s10 + $0xb0] sm:$0xff]  ;;  %s305_s15 = scalar_lea.vmem %s3938_s8, %s2899_s12 }
  0x11   : > { %408 = vmatpush.msra.mxu1 %v329_v3  ;;  %v327_v6 = vld [vmem:[%s3192_s10 + $0xa8] sm:$0xff]  ;;  %v317_v7 = vld [vmem:[%s3192_s10 + $0x58] sm:$0xff]  ;;  %v326_v8 = vld [vmem:[%s3192_s10 + $0xa0] sm:$0xff] }
  0x12   : > { %372 = vmatpush.msra.mxu0 %v320_v1  ;;  %v316_v9 = vld [vmem:[%s3192_s10 + $0x50] sm:$0xff]  ;;  %v325_v10 = vld [vmem:[%s3192_s10 + $0x98] sm:$0xff]  ;;  %v315_v12 = vld [vmem:[%s3192_s10 + $0x48] sm:$0xff] }
  0x13   : > { %409 = vmatpush.msra.mxu1 %v328_v5  ;;  %v324_v13 = vld [vmem:[%s3192_s10 + $0x90] sm:$0xff]  ;;  %v314_v14 = vld [vmem:[%s3192_s10 + $0x40] sm:$0xff]  ;;  %v323_v15 = vld [vmem:[%s3192_s10 + $0x88] sm:$0xff] }
  0x14   : > { %373 = vmatpush.msra.mxu0 %v319_v2  ;;  %v313_v16 = vld [vmem:[%s3192_s10 + $0x38] sm:$0xff]  ;;  %v322_v17 = vld [vmem:[%s3192_s10 + $0x80] sm:$0xff]  ;;  %v312_v18 = vld [vmem:[%s3192_s10 + $0x30] sm:$0xff]  ;;  %348 = vrot.lane.b32.xlu0 %v3225_v20, %s3111_s13  ;;  %v2986_v56 = vpop.eup %2985 }
  0x15   : > { %410 = vmatpush.msra.mxu1 %v327_v6  ;;  %v311_v21 = vld [vmem:[%s3192_s10 + $0x28] sm:$0xff]  ;;  %v310_v22 = vld [vmem:[%s3192_s10 + $0x20] sm:$0xff]  ;;  %v309_v23 = vld [vmem:[%s3192_s10 + $0x18] sm:$0xff]  ;;  %352 = vrot.lane.b32.xlu1 %v3255_v32, %s3111_s13  ;;  %v444_v0 = vmul.f32 32.0, %v2986_v56  ;;  %vm448_vm2 = vweird.f32 %v2986_v56 }
  0x16   : > { %374 = vmatpush.msra.mxu0 %v318_v4  ;;  %v308_v24 = vld [vmem:[%s3192_s10 + $0x10] sm:$0xff]  ;;  %v307_v27 = vld [vmem:[%s3192_s10 + $0x8] sm:$0xff]  ;;  %v306_v30 = vld [vmem:[%s3192_s10] sm:$0xff] }
  0x17   : > { %411 = vmatpush.msra.mxu1 %v326_v8  ;;  %493 = vperm.xlu2 %2936, %v3225_v20   ;;  %v445_v5 = vsub.f32 1.0, %v444_v0 }
  0x18   : > { %375 = vmatpush.msra.mxu0 %v317_v7 }
  0x19   : > { %412 = vmatpush.msra.mxu1 %v325_v10  ;;  %v446_v8 = vmul.f32 %v2986_v56, %v445_v5 }
  0x1a   : > { %376 = vmatpush.msra.mxu0 %v316_v9 }
  0x1b   : > { %413 = vmatpush.msra.mxu1 %v324_v13 }
  0x1c   : > { %377 = vmatpush.msra.mxu0 %v315_v12  ;;  %497 = vperm.xlu0 %2937, %v3240_v26   ;;  %v447_v12 = vadd.f32 %v2986_v56, %v446_v8 }
  0x1d   : > { %414 = vmatpush.msra.mxu1 %v323_v15  ;;  %509 = vperm.xlu1 %2938, %v3208_v11  }
  0x1e   : > { %378 = vmatpush.msra.mxu0 %v314_v14  ;;  %v3294_v15 = vsel %vm448_vm2, %v2986_v56, %v447_v12 }
  0x1f   : > { %415 = vmatpush.msra.mxu1 %v322_v17  ;;  %2939 = vset.pattern.permute.xlu2 %v3112_v28 }
  0x20   : > { %379 = vmatpush.msra.mxu0 %v313_v16  ;;  %2783 = vmatmul.msk.f32.vlgmr.msra.gmra.mxu1 %vm358_vm0, %v331_v19 }
  0x21   : > { %513 = vperm.xlu2 %2939, %v3225_v20  }
  0x22   : > { %380 = vmatpush.msra.mxu0 %v312_v18 }
  0x24   : > { %381 = vmatpush.msra.mxu0 %v311_v21  ;;  %2941 = vset.pattern.permute.xlu0 %v3112_v28 }
  0x25   : > { %521 = vperm.xlu0 %2941, %v3255_v32   ;;  %2940 = vset.pattern.permute.xlu1 %v3113_v29 }
  0x26   : > { %382 = vmatpush.msra.mxu0 %v310_v22  ;;  %501 = vperm.xlu1 %2940, %v3255_v32  }
  0x28   : > { %383 = vmatpush.msra.mxu0 %v309_v23  ;;  %2784 = vmatmul.msk.f32.gmra.mxu1 %vm358_vm0, %v333_v25 }
  0x29   : > { %517 = vperm.xlu2 %2939, %v3240_v26  }
  0x2a   : > { %384 = vmatpush.msra.mxu0 %v308_v24 }
  0x2c   : > { %385 = vmatpush.msra.mxu0 %v307_v27 }
  0x2d   : > { %2945 = vset.pattern.permute.xlu0 %v3115_v41 }
  0x2e   : > { %386 = vmatpush.msra.mxu0 %v306_v30  ;;  %2942 = vset.pattern.permute.xlu1 %v3114_v38 }
  0x2f   : > { %387 = vmatmul.f32.vlgmr.msra.gmra.mxu0 %v330_v31  ;;  %592 = vperm.xlu1 %2942, %v3255_v32  }
  0x30   : > { %2785 = vmatmul.msk.f32.gmra.mxu1 %vm358_vm0, %v335_v33  ;;  %608 = vperm.xlu0 %2945, %v3240_v26  }
  0x31   : > { %2943 = vset.pattern.permute.xlu2 %v3114_v38 }
  0x32   : > { %588 = vperm.xlu2 %2943, %v3240_v26  }
  0x37   : > { %390 = vmatmul.f32.gmra.mxu0 %v332_v34  ;;  %2944 = vset.pattern.permute.xlu1 %v3115_v41 }
  0x38   : > { %2786 = vmatmul.msk.f32.gmra.mxu1 %vm358_vm0, %v337_v35  ;;  %612 = vperm.xlu1 %2944, %v3255_v32  }
  0x3a   : > { %584 = vperm.xlu2 %2943, %v3225_v20  }
  0x3f   : > { %393 = vmatmul.f32.gmra.mxu0 %v334_v36 }
  0x40   : > { %2946 = vset.pattern.permute.xlu1 %v3114_v38 }
  0x41   : > { %580 = vperm.xlu1 %2946, %v3208_v11  }
  0x42   : > { %2947 = vset.pattern.permute.xlu2 %v3115_v41 }
  0x43   : > { %604 = vperm.xlu2 %2947, %v3225_v20  }
  0x47   : > { %396 = vmatmul.f32.gmra.mxu0 %v336_v37 }
  0x49   : > { %2948 = vset.pattern.permute.xlu1 %v3115_v41 }
  0x4a   : > { %600 = vperm.xlu1 %2948, %v3208_v11  }
  0x7e   : > { %v347_v42 = vpop.permute.xlu0 %346 }
  0x7f   : > { %v351_v46 = vpop.permute.xlu1 %350 }
  0x86   : > { %v349_v45 = vpop.permute.xlu0 %348 }
  0x87   : > { %v353_v57 = vpop.permute.xlu1 %352 }
  0x9d   : > { %v417_v39 = vpop.f32.mrf.mxu1 }
  0xa5   : > { %v420_v43 = vpop.f32.mrf.mxu1 }
  0xac   : > { %v388_v40 = vpop.f32.mrf.mxu0 }
  0xad   : > { %v423_v47 = vpop.f32.mrf.mxu1  ;;  %v389_v51 = vadd.f32 %v388_v40, %v347_v42  ;;  %v490_v40 = vpop.permute.xlu2 %489 }
  0xaf   : > { %v418_v54 = vadd.f32 %v417_v39, %v389_v51 }
  0xb1   : > { %v430_v61 = vsel %vm429_vm1, %v418_v54, 0.0 }
  0xb4   : > { %v391_v44 = vpop.f32.mrf.mxu0 }
  0xb5   : > { %v392_v48 = vadd.f32 %v391_v44, %v349_v45  ;;  %v426_v60 = vpop.f32.mrf.mxu1  ;;  %v494_v45 = vpop.permute.xlu2 %493 }
  0xb7   : > { %v421_v53 = vadd.f32 %v420_v43, %v392_v48  ;;  %v510_v48 = vpop.permute.xlu1 %509 }
  0xb9   : > { %v431_v58 = vsel %vm429_vm1, %v421_v53, 0.0 }
  0xba   : > { %v432_v1 = vadd.f32 %v431_v58, %v430_v61 }
  0xbc   : > { %v394_v49 = vpop.f32.mrf.mxu0 }
  0xbd   : > { %v395_v52 = vadd.f32 %v394_v49, %v351_v46  ;;  %v514_v51 = vpop.permute.xlu2 %513 }
  0xbf   : > { %v424_v55 = vadd.f32 %v423_v47, %v395_v52  ;;  %v498_v52 = vpop.permute.xlu0 %497  ;;  %v502_v56 = vpop.permute.xlu1 %501 }
  0xc1   : > { %v433_v62 = vsel %vm429_vm1, %v424_v55, 0.0 }
  0xc2   : > { %v434_v3 = vadd.f32 %v433_v62, %v432_v1 }
  0xc4   : > { %v397_v59 = vpop.f32.mrf.mxu0 }
  0xc5   : > { %v398_v63 = vadd.f32 %v397_v59, %v353_v57  ;;  %v518_v1 = vpop.permute.xlu2 %517 }
  0xc7   : > { %v427_v2 = vadd.f32 %v426_v60, %v398_v63 }
  0xc9   : > { %v435_v4 = vsel %vm429_vm1, %v427_v2, 0.0 }
  0xca   : > { %v436_v6 = vadd.f32 %v435_v4, %v434_v3 }
  0xcc   : > { %v437_v7 = vrot.slane %v436_v6, 4 }
  0xce   : > { %v438_v9 = vadd.f32 %v437_v7, %v436_v6 }
  0xd0   : > { %v439_v10 = vrot.slane %v438_v9, 2 }
  0xd2   : > { %v440_v13 = vadd.f32 %v439_v10, %v438_v9 }
  0xd4   : > { %v441_v14 = vrot.slane %v440_v13, 1 }
  0xd6   : > { %v442_v16 = vadd.f32 %v441_v14, %v440_v13 }
  0xd8   : > { %v450_v17 = vmul.f32 %v3294_v15, %v442_v16 }
  0xda   : > { %v452_v18 = vsub.f32 %v421_v53, %v450_v17  ;;  %v453_v19 = vsub.f32 %v424_v55, %v450_v17  ;;  %v454_v21 = vsub.f32 %v427_v2, %v450_v17  ;;  %v451_v22 = vsub.f32 %v418_v54, %v450_v17  ;;  %v522_v2 = vpop.permute.xlu0 %521 }
  0xdc   : > { %v455_v23 = vmul.f32 %v451_v22, %v451_v22  ;;  %v456_v24 = vmul.f32 %v452_v18, %v452_v18  ;;  %v457_v25 = vmul.f32 %v453_v19, %v453_v19  ;;  %v458_v27 = vmul.f32 %v454_v21, %v454_v21 }
  0xde   : > { %v459_v28 = vsel %vm429_vm1, %v455_v23, 0.0  ;;  %v460_v29 = vsel %vm429_vm1, %v456_v24, 0.0  ;;  %v462_v31 = vsel %vm429_vm1, %v457_v25, 0.0  ;;  %v464_v34 = vsel %vm429_vm1, %v458_v27, 0.0 }
  0xdf   : > { %v461_v30 = vadd.f32 %v460_v29, %v459_v28 }
  0xe1   : > { %v463_v33 = vadd.f32 %v462_v31, %v461_v30 }
  0xe3   : > { %v465_v35 = vadd.f32 %v464_v34, %v463_v33 }
  0xe5   : > { %v466_v36 = vrot.slane %v465_v35, 4 }
  0xe7   : > { %v467_v37 = vadd.f32 %v466_v36, %v465_v35 }
  0xe9   : > { %v468_v38 = vrot.slane %v467_v37, 2 }
  0xeb   : > { %v469_v39 = vadd.f32 %v468_v38, %v467_v37 }
  0xed   : > { %v470_v41 = vrot.slane %v469_v39, 1 }
  0xef   : > { %v471_v42 = vadd.f32 %v470_v41, %v469_v39 }
  0xf1   : > { %v472_v43 = vmul.f32 %v471_v42, %v3294_v15 }
  0xf3   : > { %v473_v44 = vadd.f32 1e-05, %v472_v43 }
  0xf5   : > { %2987 = vrsqrt.f32 %v473_v44  ;;  %vm480_vm4 = vweird.f32 %v473_v44 }
  0xfb   : > { %v2988_v46 = vpop.eup %2987 }
  0xfc   : > { %v475_v47 = vmul.f32 %v2988_v46, %v473_v44  ;;  %vm481_vm3 = vweird.f32 %v2988_v46 }
  0xfd   : > { %vm482_vm5 = vmor %vm480_vm4, %vm481_vm3 }
  0xfe   : > { %v476_v49 = vmul.f32 %v2988_v46, %v475_v47  ;;  %v593_v47 = vpop.permute.xlu1 %592 }
 0x100   : > { %v477_v50 = vmul.f32 0.5, %v476_v49 }
 0x102   : > { %v478_v53 = vsub.f32 1.5, %v477_v50  ;;  %v589_v50 = vpop.permute.xlu2 %588 }
 0x104   : > { %v479_v54 = vmul.f32 %v2988_v46, %v478_v53 }
 0x106   : > { %v483_v55 = vsel %vm482_vm5, %v2988_v46, %v479_v54  ;;  %v3117_v54 = vmov 11  }
 0x107   : > { %v484_v57 = vmul.f32 %v483_v55, %v451_v22  ;;  %v485_v58 = vmul.f32 %v483_v55, %v452_v18  ;;  %v486_v59 = vmul.f32 %v483_v55, %v453_v19  ;;  %v487_v60 = vmul.f32 %v483_v55, %v454_v21  ;;  %2950 = vset.pattern.permute.xlu0 %v3117_v54 }
 0x108   : > { %2949 = vset.pattern.permute.xlu2 %v3117_v54  ;;  %650 = vperm.xlu0 %2950, %v3225_v20  }
 0x109   : > { %v504_v61 = vmul.f32 %v490_v40, %v484_v57  ;;  %v505_v62 = vmul.f32 %v494_v45, %v485_v58  ;;  %v506_v63 = vmul.f32 %v498_v52, %v486_v59  ;;  %v507_v0 = vmul.f32 %v502_v56, %v487_v60  ;;  %645 = vperm.xlu2 %2949, %v3208_v11  }
 0x10a   : > { %2951 = vset.pattern.permute.xlu1 %v3117_v54  ;;  %v585_v59 = vpop.permute.xlu2 %584 }
 0x10b   : > { %v3302_v3 = vadd.f32 %v514_v51, %v505_v62  ;;  %v3304_v4 = vadd.f32 %v510_v48, %v504_v61  ;;  %v3306_v5 = vadd.f32 %v518_v1, %v506_v63  ;;  %v3312_v8 = vadd.f32 %v522_v2, %v507_v0  ;;  %v613_v51 = vpop.permute.xlu1 %612 }
 0x10d   : > { %v529_v6 = vsel %vm429_vm1, %v3302_v3, 0.0  ;;  %v528_v7 = vsel %vm429_vm1, %v3304_v4, 0.0  ;;  %v531_v10 = vsel %vm429_vm1, %v3306_v5, 0.0  ;;  %v533_v13 = vsel %vm429_vm1, %v3312_v8, 0.0 }
 0x10e   : > { %v530_v9 = vadd.f32 %v529_v6, %v528_v7  ;;  %v609_v7 = vpop.permute.xlu0 %608 }
 0x110   : > { %v532_v12 = vadd.f32 %v531_v10, %v530_v9 }
 0x111   : > { %655 = vperm.xlu2 %2949, %v3240_v26  }
 0x112   : > { %v534_v14 = vadd.f32 %v533_v13, %v532_v12  ;;  %v605_v12 = vpop.permute.xlu2 %604  ;;  %v3334_v13 = vld [vmem:[%s3932_s2 + $0x30] sm:$0xff] }
 0x113   : > { %v581_v60 = vpop.permute.xlu1 %580  ;;  %675 = vperm.xlu0 %2950, %v3334_v13  }
 0x114   : > { %v535_v16 = vrot.slane %v534_v14, 4 }
 0x116   : > { %v536_v17 = vadd.f32 %v535_v16, %v534_v14 }
 0x118   : > { %v537_v18 = vrot.slane %v536_v17, 2 }
 0x119   : > { %660 = vperm.xlu2 %2949, %v3255_v32  }
 0x11a   : > { %v538_v19 = vadd.f32 %v537_v18, %v536_v17 }
 0x11b   : > { %v601_v17 = vpop.permute.xlu1 %600 }
 0x11c   : > { %v539_v21 = vrot.slane %v538_v19, 1 }
 0x11e   : > { %v540_v22 = vadd.f32 %v539_v21, %v538_v19  ;;  %v619_v21 = vld [vmem:[%s3933_s3] sm:$0xff] }
 0x120   : > { %v541_v23 = vmul.f32 %v540_v22, %v3294_v15  ;;  %v620_v22 = vld [vmem:[%s3933_s3 + $0x8] sm:$0xff] }
 0x122   : > { %v542_v24 = vsub.f32 %v3304_v4, %v541_v23  ;;  %v543_v25 = vsub.f32 %v3302_v3, %v541_v23  ;;  %v544_v27 = vsub.f32 %v3306_v5, %v541_v23  ;;  %v545_v28 = vsub.f32 %v3312_v8, %v541_v23  ;;  %v621_v23 = vld [vmem:[%s3933_s3 + $0x10] sm:$0xff] }
 0x124   : > { %v546_v29 = vmul.f32 %v542_v24, %v542_v24  ;;  %v547_v30 = vmul.f32 %v543_v25, %v543_v25  ;;  %v548_v31 = vmul.f32 %v544_v27, %v544_v27  ;;  %v549_v33 = vmul.f32 %v545_v28, %v545_v28 }
 0x126   : > { %v550_v34 = vsel %vm429_vm1, %v546_v29, 0.0  ;;  %v551_v35 = vsel %vm429_vm1, %v547_v30, 0.0  ;;  %v553_v37 = vsel %vm429_vm1, %v548_v31, 0.0  ;;  %v555_v39 = vsel %vm429_vm1, %v549_v33, 0.0  ;;  %v624_v29 = vld [vmem:[%s3933_s3 + $0x28] sm:$0xff]  ;;  %v3376_v30 = vld [vmem:[%s3932_s2 + $0x38] sm:$0xff] }
 0x127   : > { %v552_v36 = vadd.f32 %v551_v35, %v550_v34  ;;  %v625_v31 = vld [vmem:[%s3933_s3 + $0x30] sm:$0xff]  ;;  %v626_v33 = vld [vmem:[%s3933_s3 + $0x38] sm:$0xff] }
 0x129   : > { %v554_v38 = vadd.f32 %v553_v37, %v552_v36 }
 0x12b   : > { %v556_v40 = vadd.f32 %v555_v39, %v554_v38 }
 0x12d   : > { %v557_v41 = vrot.slane %v556_v40, 4 }
 0x12f   : > { %v558_v42 = vadd.f32 %v557_v41, %v556_v40 }
 0x131   : > { %v559_v43 = vrot.slane %v558_v42, 2 }
 0x133   : > { %v560_v44 = vadd.f32 %v559_v43, %v558_v42 }
 0x135   : > { %v561_v45 = vrot.slane %v560_v44, 1 }
 0x137   : > { %v562_v46 = vadd.f32 %v561_v45, %v560_v44 }
 0x139   : > { %v563_v48 = vmul.f32 %v562_v46, %v3294_v15  ;;  %v630_v46 = vld [vmem:[%s3933_s3 + $0x58] sm:$0xff] }
 0x13b   : > { %v564_v49 = vadd.f32 1e-05, %v563_v48 }
 0x13d   : > { %2989 = vrsqrt.f32 %v564_v49  ;;  %vm571_vm7 = vweird.f32 %v564_v49 }
 0x143   : > { %v2990_v52 = vpop.eup %2989 }
 0x144   : > { %v566_v53 = vmul.f32 %v2990_v52, %v564_v49  ;;  %vm572_vm6 = vweird.f32 %v2990_v52 }
 0x145   : > { %vm573_vm8 = vmor %vm571_vm7, %vm572_vm6  ;;  %vm2603_vm6 = vcmask 7168  }
 0x146   : > { %v567_v55 = vmul.f32 %v2990_v52, %v566_v53 }
 0x148   : > { %v568_v56 = vmul.f32 0.5, %v567_v55 }
 0x14a   : > { %v569_v57 = vsub.f32 1.5, %v568_v56 }
 0x14c   : > { %v570_v58 = vmul.f32 %v2990_v52, %v569_v57 }
 0x14e   : > { %v574_v61 = vsel %vm573_vm8, %v2990_v52, %v570_v58 }
 0x14f   : > { %v578_v62 = vmul.f32 %v574_v61, %v545_v28  ;;  %v577_v63 = vmul.f32 %v574_v61, %v544_v27  ;;  %v576_v0 = vmul.f32 %v574_v61, %v543_v25  ;;  %v575_v6 = vmul.f32 %v574_v61, %v542_v24  ;;  %v622_v24 = vld [vmem:[%s3933_s3 + $0x18] sm:$0xff]  ;;  %v3357_v25 = vld [vmem:[%s3932_s2 + $0x20] sm:$0xff]  ;;  %v3366_v28 = vld [vmem:[%s3932_s2 + $0x28] sm:$0xff] }
 0x150   : > { %665 = vperm.xlu1 %2951, %v3357_v25   ;;  %v623_v27 = vld [vmem:[%s3933_s3 + $0x20] sm:$0xff] }
 0x151   : > { %v598_v1 = vmul.f32 %v593_v47, %v578_v62  ;;  %v597_v2 = vmul.f32 %v589_v50, %v577_v63  ;;  %v596_v10 = vmul.f32 %v585_v59, %v576_v0  ;;  %v595_v14 = vmul.f32 %v581_v60, %v575_v6  ;;  %v627_v63 = vld [vmem:[%s3933_s3 + $0x40] sm:$0xff] }
 0x153   : > { %v618_v9 = vadd.f32 %v613_v51, %v598_v1  ;;  %v617_v16 = vadd.f32 %v609_v7, %v597_v2  ;;  %v616_v18 = vadd.f32 %v605_v12, %v596_v10  ;;  %v615_v19 = vadd.f32 %v601_v17, %v595_v14  ;;  %v628_v1 = vld [vmem:[%s3933_s3 + $0x48] sm:$0xff]  ;;  %v629_v7 = vld [vmem:[%s3933_s3 + $0x50] sm:$0xff] }
 0x155   : > { %752 = vmatpush.msra.mxu2 %v618_v9  ;;  %2900 = vmatpush.msra.mxu3 %v618_v9 }
 0x157   : > { %753 = vmatpush.msra.mxu2 %v617_v16  ;;  %2901 = vmatpush.msra.mxu3 %v617_v16 }
 0x158   : > { %670 = vperm.xlu1 %2951, %v3366_v28  }
 0x159   : > { %754 = vmatpush.msra.mxu2 %v616_v18  ;;  %2902 = vmatpush.msra.mxu3 %v616_v18  ;;  %v639_v18 = vld [vmem:[%s3932_s2 + $0x40] sm:$0xff] }
 0x15b   : > { %755 = vmatpush.msra.mxu2 %v615_v19  ;;  %2903 = vmatpush.msra.mxu3 %v615_v19  ;;  %v641_v19 = vld [vmem:[%s3932_s2 + $0x50] sm:$0xff] }
 0x15c   : > { %2787 = vmatmul.msk.f32.vlgmr.msra.gmra.mxu2 %vm703_vm9, %v619_v21  ;;  %2798 = vmatmul.msk.f32.vlgmr.msra.gmra.mxu3 %vm703_vm9, %v630_v46  ;;  %v640_v46 = vld [vmem:[%s3932_s2 + $0x48] sm:$0xff] }
 0x160   : > { %680 = vperm.xlu1 %2951, %v3376_v30  }
 0x163   : > { %v646_v34 = vpop.permute.xlu2 %645 }
 0x164   : > { %2788 = vmatmul.msk.f32.gmra.mxu2 %vm703_vm9, %v620_v22 }
 0x16b   : > { %v656_v40 = vpop.permute.xlu2 %655 }
 0x16c   : > { %2789 = vmatmul.msk.f32.gmra.mxu2 %vm703_vm9, %v621_v23 }
 0x173   : > { %v661_v43 = vpop.permute.xlu2 %660 }
 0x174   : > { %2790 = vmatmul.msk.f32.gmra.mxu2 %vm703_vm9, %v622_v24 }
 0x17a   : > { %v651_v37 = vpop.permute.xlu0 %650 }
 0x17c   : > { %2791 = vmatmul.msk.f32.gmra.mxu2 %vm703_vm9, %v623_v27 }
 0x184   : > { %2792 = vmatmul.msk.f32.gmra.mxu2 %vm703_vm9, %v624_v29 }
 0x185   : > { %v676_v54 = vpop.permute.xlu0 %675 }
 0x18c   : > { %2793 = vmatmul.msk.f32.gmra.mxu2 %vm703_vm9, %v625_v31 }
 0x194   : > { %2794 = vmatmul.msk.f32.gmra.mxu2 %vm703_vm9, %v626_v33 }
 0x19c   : > { %2795 = vmatmul.msk.f32.gmra.mxu2 %vm703_vm9, %v627_v63 }
 0x1a4   : > { %2796 = vmatmul.msk.f32.gmra.mxu2 %vm703_vm9, %v628_v1 }
 0x1ac   : > { %2797 = vmatmul.msk.f32.gmra.mxu2 %vm703_vm9, %v629_v7 }
 0x1c2   : > { %v666_v47 = vpop.permute.xlu1 %665 }
 0x1ca   : > { %v671_v51 = vpop.permute.xlu1 %670 }
 0x1d2   : > { %v681_v57 = vpop.permute.xlu1 %680 }
 0x1df   : > { %v757_v35 = vpop.f32.mrf.mxu2  ;;  %v3399_v0 = vpop.f32.mrf.mxu3 }
 0x1e0   : > { %v758_v36 = vadd.f32 %v757_v35, %v646_v34 }
 0x1e2   : > { %793 = vxpose.xlu2.b32.start.end [1/1] (short) (narrow) %v758_v36, 8 }
 0x1e7   : > { %v760_v38 = vpop.f32.mrf.mxu2 }
 0x1e8   : > { %v761_v39 = vadd.f32 %v760_v38, %v651_v37 }
 0x1ea   : > { %825 = vxpose.xlu0.b32.start.end [1/1] (short) (narrow) %v761_v39, 8 }
 0x1ef   : > { %v763_v41 = vpop.f32.mrf.mxu2 }
 0x1f0   : > { %v764_v42 = vadd.f32 %v763_v41, %v656_v40 }
 0x1f2   : > { %857 = vxpose.xlu1.b32.start.end [1/1] (short) (narrow) %v764_v42, 8 }
 0x1f7   : > { %v766_v44 = vpop.f32.mrf.mxu2 }
 0x1f8   : > { %v767_v45 = vadd.f32 %v766_v44, %v661_v43 }
 0x1fa   : > { %889 = vxpose.xlu2.b32.start.end [1/1] (short) (narrow) %v767_v45, 8 }
 0x1ff   : > { %v769_v48 = vpop.f32.mrf.mxu2 }
 0x200   : > { %v770_v49 = vadd.f32 %v769_v48, %v666_v47  ;;  %v642_v47 = vld [vmem:[%s3932_s2 + $0x58] sm:$0xff] }
 0x202   : > { %940 = vmatpush.msrb.mxu3 %v770_v49 }
 0x207   : > { %v772_v50 = vpop.f32.mrf.mxu2 }
 0x208   : > { %v773_v52 = vadd.f32 %v772_v50, %v671_v51 }
 0x20a   : > { %963 = vmatpush.msra.mxu3 %v773_v52 }
 0x20f   : > { %v775_v53 = vpop.f32.mrf.mxu2 }
 0x210   : > { %v776_v55 = vadd.f32 %v775_v53, %v676_v54 }
 0x217   : > { %v778_v58 = vpop.f32.mrf.mxu2 }
 0x218   : > { %v779_v59 = vadd.f32 %v778_v58, %v681_v57 }
 0x21f   : > { %v781_v52 = vpop.f32.mrf.mxu2 }
 0x27b   : > { %v809_v56 = vpop.trf.xlu2 }
 0x27c   : > { %2799 = vmatmul.msk.f32.vlgmr.msrb.gmra.mxu3 %vm921_vm10, %v809_v56 }
 0x27d   : > { %986 = vmatpush.msrb.mxu3 %v776_v55  ;;  %v784_v55 = vpop.f32.mrf.mxu2 }
 0x28e   : > { %v841_v60 = vpop.trf.xlu0 }
 0x28f   : > { %2800 = vmatmul.msk.f32.vlgmr.msra.gmra.mxu3 %vm921_vm10, %v841_v60 }
 0x290   : > { %1009 = vmatpush.msra.mxu3 %v779_v59 }
 0x293   : > { %v905_v62 = vpop.trf.xlu2 }
 0x296   : > { %v873_v61 = vpop.trf.xlu1 }
 0x297   : > { %2801 = vmatmul.msk.f32.vlgmr.msrb.gmra.mxu3 %vm921_vm10, %v873_v61 }
 0x29f   : > { %2802 = vmatmul.msk.f32.vlgmr.msra.gmra.mxu3 %vm921_vm10, %v905_v62  ;;  %v787_v62 = vpop.f32.mrf.mxu2 }
 0x2ff   : > { %v942_v2 = vpop.f32.mrf.mxu3 }
 0x300   : > { %v1015_v6 = vsel %vm1014_vm11, %v942_v2, -inf }
 0x301   : > { %1016 = vmax.xlane.f32.xlu0 %v1015_v6 }
 0x312   : > { %v965_v9 = vpop.f32.mrf.mxu3 }
 0x313   : > { %v1018_v10 = vsel %vm1014_vm11, %v965_v9, -inf }
 0x314   : > { %1019 = vmax.xlane.f32.xlu2 %v1018_v10 }
 0x31a   : > { %v988_v12 = vpop.f32.mrf.mxu3 }
 0x31b   : > { %v1021_v14 = vsel %vm1014_vm11, %v988_v12, -inf }
 0x31c   : > { %1022 = vmax.xlane.f32.xlu0 %v1021_v14 }
 0x322   : > { %v1011_v16 = vpop.f32.mrf.mxu3 }
 0x323   : > { %v1024_v17 = vsel %vm1014_vm11, %v1011_v16, -inf }
 0x324   : > { %1025 = vmax.xlane.f32.xlu1 %v1024_v17 }
 0x330   : > { %685 = vperm.xlu0 %2950, %v639_v18  }
 0x338   : > { %695 = vperm.xlu0 %2950, %v641_v19   ;;  %v3119_v19 = vmov 14  }
 0x374   : > { %v1017_v21 = vpop.xlane.xlu0 %1016 }
 0x375   : > { %v1027_v22 = vsub.f32 %v942_v2, %v1017_v21  ;;  %v3120_v21 = vmov 13  }
 0x377   : > { %v1031_v23 = vmul.f32 1.442695, %v1027_v22  ;;  %v1163_v22 = vld [vmem:[%s3934_s4] sm:$0xff] }
 0x379   : > { %2991 = vpow2.f32 %v1031_v23  ;;  %v1164_v23 = vld [vmem:[%s3934_s4 + $0x8] sm:$0xff] }
 0x37f   : > { %v2992_v24 = vpop.eup %2991 }
 0x380   : > { %v1039_v27 = vsel %vm1014_vm11, %v2992_v24, 0.0 }
 0x381   : > { %1040 = vadd.xlane.f32.xlu1 %v1039_v27 }
 0x387   : > { %v1020_v29 = vpop.xlane.xlu2 %1019 }
 0x388   : > { %v1028_v31 = vsub.f32 %v965_v9, %v1020_v29 }
 0x38a   : > { %v1033_v33 = vmul.f32 1.442695, %v1028_v31 }
 0x38c   : > { %2993 = vpow2.f32 %v1033_v33 }
 0x38f   : > { %v1023_v34 = vpop.xlane.xlu0 %1022 }
 0x390   : > { %v1029_v35 = vsub.f32 %v988_v12, %v1023_v34 }
 0x392   : > { %v2994_v36 = vpop.eup %2993  ;;  %v1035_v37 = vmul.f32 1.442695, %v1029_v35 }
 0x393   : > { %v1042_v38 = vsel %vm1014_vm11, %v2994_v36, 0.0 }
 0x394   : > { %2995 = vpow2.f32 %v1035_v37  ;;  %1043 = vadd.xlane.f32.xlu2 %v1042_v38 }
 0x397   : > { %v1026_v39 = vpop.xlane.xlu1 %1025 }
 0x398   : > { %v1030_v40 = vsub.f32 %v1011_v16, %v1026_v39  ;;  %v3118_v16 = vmov 12  }
 0x399   : > { %2952 = vset.pattern.permute.xlu0 %v3118_v16 }
 0x39a   : > { %v2996_v41 = vpop.eup %2995  ;;  %v1037_v42 = vmul.f32 1.442695, %v1030_v40  ;;  %1173 = vperm.xlu0 %2952, %v3208_v11  }
 0x39b   : > { %v1045_v43 = vsel %vm1014_vm11, %v2996_v41, 0.0 }
 0x39c   : > { %2997 = vpow2.f32 %v1037_v42  ;;  %1046 = vadd.xlane.f32.xlu1 %v1045_v43 }
 0x3a2   : > { %v2998_v44 = vpop.eup %2997  ;;  %v686_v50 = vpop.permute.xlu0 %685  ;;  %2955 = vset.pattern.permute.xlu0 %v3120_v21 }
 0x3a3   : > { %v1048_v45 = vsel %vm1014_vm11, %v2998_v44, 0.0  ;;  %v782_v53 = vadd.f32 %v781_v52, %v686_v50  ;;  %1300 = vperm.xlu0 %2955, %v3255_v32  }
 0x3a4   : > { %1049 = vadd.xlane.f32.xlu1 %v1048_v45 }
 0x3aa   : > { %v696_v63 = vpop.permute.xlu0 %695 }
 0x3ab   : > { %v788_v6 = vadd.f32 %v787_v62, %v696_v63  ;;  %1288 = vperm.xlu0 %2955, %v3208_v11  }
 0x3ac   : > { %690 = vperm.xlu2 %2949, %v640_v46  }
 0x3b4   : > { %2953 = vset.pattern.permute.xlu2 %v3118_v16 }
 0x3b5   : > { %1178 = vperm.xlu2 %2953, %v3225_v20  }
 0x3bd   : > { %700 = vperm.xlu1 %2951, %v642_v47   ;;  %1183 = vperm.xlu2 %2953, %v3240_v26  }
 0x3c5   : > { %2954 = vset.pattern.permute.xlu1 %v3118_v16  ;;  %2956 = vset.pattern.permute.xlu2 %v3120_v21  ;;  %v3121_v21 = vmov 15  }
 0x3c6   : > { %1188 = vperm.xlu1 %2954, %v3255_v32   ;;  %1296 = vperm.xlu2 %2956, %v3240_v26  }
 0x3c7   : > { %2959 = vset.pattern.permute.xlu0 %v3121_v21 }
 0x3c8   : > { %1380 = vperm.xlu0 %2959, %v3376_v30  }
 0x3ce   : > { %2957 = vset.pattern.permute.xlu1 %v3119_v19  ;;  %1292 = vperm.xlu2 %2956, %v3225_v20  }
 0x3cf   : > { %1320 = vperm.xlu1 %2957, %v3255_v32  }
 0x3d6   : > { %2958 = vset.pattern.permute.xlu2 %v3119_v19 }
 0x3d7   : > { %1316 = vperm.xlu1 %2957, %v3240_v26   ;;  %1312 = vperm.xlu2 %2958, %v3225_v20   ;;  %v1166_v26 = vld [vmem:[%s3934_s4 + $0x18] sm:$0xff] }
 0x3df   : > { %1308 = vperm.xlu1 %2957, %v3208_v11   ;;  %2960 = vset.pattern.permute.xlu2 %v3121_v21 }
 0x3e0   : > { %1375 = vperm.xlu2 %2960, %v3334_v13   ;;  %v3505_v13 = vld [vmem:[%s3932_s2] sm:$0xff] }
 0x3e7   : > { %2961 = vset.pattern.permute.xlu1 %v3121_v21 }
 0x3e8   : > { %1370 = vperm.xlu1 %2961, %v3366_v28   ;;  %1365 = vperm.xlu2 %2960, %v3357_v25  }
 0x3f0   : > { %1360 = vperm.xlu1 %2961, %v3255_v32  }
 0x3f4   : > { %v1041_v48 = vpop.xlane.xlu1 %1040 }
 0x3f5   : > { %2999 = vrcp.f32 %v1041_v48 }
 0x3f8   : > { %1345 = vperm.xlu1 %2961, %v3505_v13  }
 0x3fb   : > { %v3000_v49 = vpop.eup %2999 }
 0x3fc   : > { %v1055_v51 = vmul.f32 %v3000_v49, %v2992_v24  ;;  %v1165_v24 = vld [vmem:[%s3934_s4 + $0x10] sm:$0xff] }
 0x3fe   : > { %2803 = vmatpush.xpose.msk.msrb.mxu3 %vm429_vm1, %v1055_v51 }
 0x401   : > { %2804 = vmatmul.msk.f32.vlgmr.msrb.gmra.mxu3 %vm429_vm1, %v782_v53 }
 0x407   : > { %v1044_v54 = vpop.xlane.xlu2 %1043 }
 0x408   : > { %3001 = vrcp.f32 %v1044_v54 }
 0x40c   : > { %v1174_v33 = vpop.permute.xlu0 %1173 }
 0x40e   : > { %v3002_v56 = vpop.eup %3001 }
 0x40f   : > { %v1056_v57 = vmul.f32 %v3002_v56, %v2994_v36  ;;  %v1047_v58 = vpop.xlane.xlu1 %1046  ;;  %v691_v59 = vpop.permute.xlu2 %690 }
 0x410   : > { %3003 = vrcp.f32 %v1047_v58  ;;  %v785_v60 = vadd.f32 %v784_v55, %v691_v59 }
 0x411   : > { %2805 = vmatpush.xpose.msk.msra.mxu3 %vm429_vm1, %v1056_v57 }
 0x414   : > { %2806 = vmatmul.msk.f32.vlgmr.msra.gmra.mxu3 %vm429_vm1, %v785_v60 }
 0x416   : > { %v3004_v61 = vpop.eup %3003 }
 0x417   : > { %v1050_v1 = vpop.xlane.xlu1 %1049  ;;  %v1057_v2 = vmul.f32 %v3004_v61, %v2996_v41  ;;  %v1179_v29 = vpop.permute.xlu2 %1178 }
 0x418   : > { %3005 = vrcp.f32 %v1050_v1 }
 0x419   : > { %2807 = vmatpush.xpose.msk.msrb.mxu1 %vm429_vm1, %v1057_v2 }
 0x41c   : > { %2808 = vmatmul.msk.f32.vlgmr.msrb.gmra.mxu1 %vm429_vm1, %v788_v6 }
 0x41e   : > { %v3006_v7 = vpop.eup %3005 }
 0x41f   : > { %v1058_v9 = vmul.f32 %v3006_v7, %v2998_v44  ;;  %v1184_v34 = vpop.permute.xlu2 %1183 }
 0x421   : > { %2809 = vmatpush.xpose.msk.msrb.mxu3 %vm429_vm1, %v1058_v9 }
 0x42f   : > { %v701_v10 = vpop.permute.xlu1 %700 }
 0x430   : > { %v791_v12 = vadd.f32 %v3399_v0, %v701_v10 }
 0x432   : > { %2810 = vmatmul.msk.f32.vlgmr.msrb.gmra.mxu3 %vm429_vm1, %v791_v12 }
 0x438   : > { %v1189_v40 = vpop.permute.xlu1 %1188 }
 0x484   : > { %v1082_v14 = vpop.f32.mrf.mxu3 }
 0x497   : > { %v1108_v17 = vpop.f32.mrf.mxu3 }
 0x499   : > { %v1134_v0 = vpop.f32.mrf.mxu1 }
 0x4b5   : > { %v1160_v18 = vpop.f32.mrf.mxu3 }
 0x4b6   : > { %1215 = vmatpush.msra.mxu1 %v1160_v18 }
 0x4b8   : > { %1216 = vmatpush.msra.mxu1 %v1134_v0 }
 0x4ba   : > { %1217 = vmatpush.msra.mxu1 %v1108_v17 }
 0x4bc   : > { %1218 = vmatpush.msra.mxu1 %v1082_v14 }
 0x4bd   : > { %2811 = vmatmul.msk.f32.vlgmr.msra.gmra.mxu1 %vm703_vm9, %v1163_v22  ;;  %v1297_v22 = vpop.permute.xlu2 %1296 }
 0x4c5   : > { %2812 = vmatmul.msk.f32.gmra.mxu1 %vm703_vm9, %v1164_v23 }
 0x4cd   : > { %2813 = vmatmul.msk.f32.gmra.mxu1 %vm703_vm9, %v1165_v24  ;;  %v1321_v24 = vpop.permute.xlu1 %1320 }
 0x4d5   : > { %2814 = vmatmul.msk.f32.gmra.mxu1 %vm703_vm9, %v1166_v26  ;;  %v1317_v32 = vpop.permute.xlu1 %1316 }
 0x53a   : > { %v1220_v27 = vpop.f32.mrf.mxu1 }
 0x53b   : > { %v1221_v36 = vadd.f32 %v1220_v27, %v1174_v33  ;;  %v1301_v33 = vpop.permute.xlu0 %1300 }
 0x53d   : > { %v3471_v20 = vadd.f32 %v1221_v36, %v3304_v4 }
 0x53f   : > { %v1236_v43 = vsel %vm429_vm1, %v3471_v20, 0.0 }
 0x542   : > { %v1223_v31 = vpop.f32.mrf.mxu1 }
 0x543   : > { %v1224_v11 = vadd.f32 %v1223_v31, %v1179_v29 }
 0x545   : > { %v3468_v38 = vadd.f32 %v1224_v11, %v3302_v3 }
 0x547   : > { %v1237_v41 = vsel %vm429_vm1, %v3468_v38, 0.0 }
 0x548   : > { %v1238_v3 = vadd.f32 %v1237_v41, %v1236_v43 }
 0x54a   : > { %v1226_v35 = vpop.f32.mrf.mxu1 }
 0x54b   : > { %v1227_v37 = vadd.f32 %v1226_v35, %v1184_v34  ;;  %v1293_v34 = vpop.permute.xlu2 %1292 }
 0x54d   : > { %v3474_v39 = vadd.f32 %v1227_v37, %v3306_v5 }
 0x54f   : > { %v1239_v44 = vsel %vm429_vm1, %v3474_v39, 0.0 }
 0x550   : > { %v1240_v4 = vadd.f32 %v1239_v44, %v1238_v3 }
 0x552   : > { %v1229_v42 = vpop.f32.mrf.mxu1 }
 0x553   : > { %v1230_v45 = vadd.f32 %v1229_v42, %v1189_v40  ;;  %v1313_v3 = vpop.permute.xlu2 %1312 }
 0x555   : > { %v3483_v46 = vadd.f32 %v1230_v45, %v3312_v8  ;;  %v1289_v45 = vpop.permute.xlu0 %1288 }
 0x557   : > { %v1241_v5 = vsel %vm429_vm1, %v3483_v46, 0.0 }
 0x558   : > { %v1242_v47 = vadd.f32 %v1241_v5, %v1240_v4 }
 0x55a   : > { %v1243_v48 = vrot.slane %v1242_v47, 4 }
 0x55c   : > { %v1244_v49 = vadd.f32 %v1243_v48, %v1242_v47  ;;  %v1309_v48 = vpop.permute.xlu1 %1308 }
 0x55e   : > { %v1245_v50 = vrot.slane %v1244_v49, 2 }
 0x560   : > { %v1246_v51 = vadd.f32 %v1245_v50, %v1244_v49  ;;  %v1327_v50 = vld [vmem:[%s3935_s5] sm:$0xff] }
 0x562   : > { %v1247_v52 = vrot.slane %v1246_v51, 1 }
 0x564   : > { %v1248_v53 = vadd.f32 %v1247_v52, %v1246_v51  ;;  %v3515_v51 = vld [vmem:[%s3932_s2 + $0x10] sm:$0xff]  ;;  %v1328_v52 = vld [vmem:[%s3935_s5 + $0x8] sm:$0xff] }
 0x565   : > { %1355 = vperm.xlu0 %2959, %v3515_v51  }
 0x566   : > { %v1249_v54 = vmul.f32 %v1248_v53, %v3294_v15  ;;  %v1329_v53 = vld [vmem:[%s3935_s5 + $0x10] sm:$0xff] }
 0x568   : > { %v1253_v55 = vsub.f32 %v3483_v46, %v1249_v54  ;;  %v1250_v56 = vsub.f32 %v3471_v20, %v1249_v54  ;;  %v1251_v8 = vsub.f32 %v3468_v38, %v1249_v54  ;;  %v1252_v57 = vsub.f32 %v3474_v39, %v1249_v54  ;;  %v3529_v54 = vld [vmem:[%s3932_s2 + $0x8] sm:$0xff] }
 0x569   : > { %1350 = vperm.xlu2 %2960, %v3529_v54  }
 0x56a   : > { %v1254_v58 = vmul.f32 %v1250_v56, %v1250_v56  ;;  %v1255_v59 = vmul.f32 %v1251_v8, %v1251_v8  ;;  %v1256_v60 = vmul.f32 %v1252_v57, %v1252_v57  ;;  %v1257_v61 = vmul.f32 %v1253_v55, %v1253_v55 }
 0x56c   : > { %v1258_v62 = vsel %vm429_vm1, %v1254_v58, 0.0  ;;  %v1259_v63 = vsel %vm429_vm1, %v1255_v59, 0.0  ;;  %v1261_v2 = vsel %vm429_vm1, %v1256_v60, 0.0  ;;  %v1263_v7 = vsel %vm429_vm1, %v1257_v61, 0.0  ;;  %v1334_v58 = vld [vmem:[%s3935_s5 + $0x38] sm:$0xff] }
 0x56d   : > { %v1260_v1 = vadd.f32 %v1259_v63, %v1258_v62 }
 0x56f   : > { %v1262_v6 = vadd.f32 %v1261_v2, %v1260_v1  ;;  %v1376_v1 = vpop.permute.xlu2 %1375  ;;  %v1371_v2 = vpop.permute.xlu1 %1370 }
 0x571   : > { %v1264_v9 = vadd.f32 %v1263_v7, %v1262_v6  ;;  %v1381_v7 = vpop.permute.xlu0 %1380 }
 0x573   : > { %v1265_v10 = vrot.slane %v1264_v9, 4 }
 0x575   : > { %v1266_v12 = vadd.f32 %v1265_v10, %v1264_v9 }
 0x577   : > { %v1267_v14 = vrot.slane %v1266_v12, 2  ;;  %v1366_v9 = vpop.permute.xlu2 %1365  ;;  %v1361_v10 = vpop.permute.xlu1 %1360 }
 0x579   : > { %v1268_v16 = vadd.f32 %v1267_v14, %v1266_v12 }
 0x57b   : > { %v1269_v17 = vrot.slane %v1268_v16, 1 }
 0x57d   : > { %v1270_v18 = vadd.f32 %v1269_v17, %v1268_v16 }
 0x57f   : > { %v1271_v19 = vmul.f32 %v1270_v18, %v3294_v15 }
 0x581   : > { %v1272_v0 = vadd.f32 1e-05, %v1271_v19 }
 0x583   : > { %3007 = vrsqrt.f32 %v1272_v0  ;;  %vm1279_vm13 = vweird.f32 %v1272_v0 }
 0x589   : > { %v3008_v23 = vpop.eup %3007 }
 0x58a   : > { %v1274_v26 = vmul.f32 %v3008_v23, %v1272_v0  ;;  %vm1280_vm12 = vweird.f32 %v3008_v23 }
 0x58b   : > { %vm1281_vm14 = vmor %vm1279_vm13, %vm1280_vm12 }
 0x58c   : > { %v1275_v27 = vmul.f32 %v3008_v23, %v1274_v26  ;;  %v1346_v26 = vpop.permute.xlu1 %1345 }
 0x58e   : > { %v1276_v29 = vmul.f32 0.5, %v1275_v27 }
 0x590   : > { %v1277_v31 = vsub.f32 1.5, %v1276_v29 }
 0x592   : > { %v1278_v11 = vmul.f32 %v3008_v23, %v1277_v31 }
 0x594   : > { %v1282_v35 = vsel %vm1281_vm14, %v3008_v23, %v1278_v11 }
 0x595   : > { %v1285_v36 = vmul.f32 %v1282_v35, %v1252_v57  ;;  %v1284_v37 = vmul.f32 %v1282_v35, %v1251_v8  ;;  %v1286_v25 = vmul.f32 %v1282_v35, %v1253_v55  ;;  %v1283_v42 = vmul.f32 %v1282_v35, %v1250_v56  ;;  %v1330_v55 = vld [vmem:[%s3935_s5 + $0x18] sm:$0xff]  ;;  %v1331_v56 = vld [vmem:[%s3935_s5 + $0x20] sm:$0xff]  ;;  %v1332_v8 = vld [vmem:[%s3935_s5 + $0x28] sm:$0xff] }
 0x596   : > { %v1333_v57 = vld [vmem:[%s3935_s5 + $0x30] sm:$0xff] }
 0x597   : > { %v1305_v40 = vmul.f32 %v1297_v22, %v1285_v36  ;;  %v1306_v41 = vmul.f32 %v1301_v33, %v1286_v25  ;;  %v1304_v43 = vmul.f32 %v1293_v34, %v1284_v37  ;;  %v1303_v5 = vmul.f32 %v1289_v45, %v1283_v42 }
 0x599   : > { %v1326_v44 = vadd.f32 %v1321_v24, %v1306_v41  ;;  %v1325_v4 = vadd.f32 %v1317_v32, %v1305_v40  ;;  %v1324_v47 = vadd.f32 %v1313_v3, %v1304_v43  ;;  %v1323_v49 = vadd.f32 %v1309_v48, %v1303_v5 }
 0x59b   : > { %1419 = vmatpush.msra.mxu3 %v1326_v44 }
 0x59d   : > { %1420 = vmatpush.msra.mxu3 %v1325_v4 }
 0x59f   : > { %1421 = vmatpush.msra.mxu3 %v1324_v47 }
 0x5a1   : > { %1422 = vmatpush.msra.mxu3 %v1323_v49 }
 0x5a2   : > { %2815 = vmatmul.msk.f32.vlgmr.msra.gmra.mxu3 %vm703_vm9, %v1327_v50 }
 0x5aa   : > { %2816 = vmatmul.msk.f32.gmra.mxu3 %vm703_vm9, %v1328_v52 }
 0x5b2   : > { %2817 = vmatmul.msk.f32.gmra.mxu3 %vm703_vm9, %v1329_v53 }
 0x5ba   : > { %2818 = vmatmul.msk.f32.gmra.mxu3 %vm703_vm9, %v1330_v55 }
 0x5c2   : > { %2819 = vmatmul.msk.f32.gmra.mxu3 %vm703_vm9, %v1331_v56  ;;  %v3122_v56 = vmov 16  }
 0x5c3   : > { %v1351_v22 = vpop.permute.xlu2 %1350  ;;  %2962 = vset.pattern.permute.xlu0 %v3122_v56  ;;  %2964 = vset.pattern.permute.xlu1 %v3122_v56 }
 0x5c4   : > { %2963 = vset.pattern.permute.xlu2 %v3122_v56 }
 0x5ca   : > { %2820 = vmatmul.msk.f32.gmra.mxu3 %vm703_vm9, %v1332_v8 }
 0x5d2   : > { %2821 = vmatmul.msk.f32.gmra.mxu3 %vm703_vm9, %v1333_v57  ;;  %v3095_v57 = vld [vmem:[%s3932_s2] sm:$0xff] }
 0x5d3   : > { %1546 = vperm.xlu0 %2962, %v3095_v57  }
 0x5d7   : > { %v1356_v19 = vpop.permute.xlu0 %1355 }
 0x5da   : > { %2822 = vmatmul.msk.f32.gmra.mxu3 %vm703_vm9, %v1334_v58  ;;  %v3096_v58 = vld [vmem:[%s3932_s2 + $0x10] sm:$0xff] }
 0x5db   : > { %1554 = vperm.xlu1 %2964, %v3096_v58  }
 0x625   : > { %v1424_v59 = vpop.f32.mrf.mxu3 }
 0x626   : > { %v3568_v35 = vadd.f32 %v1424_v59, %v1346_v26 }
 0x628   : > { %v1448_v42 = vmul.f32 -1.702, %v3568_v35 }
 0x62a   : > { %v1456_v3 = vmul.f32 1.442695, %v1448_v42 }
 0x62d   : > { %v1427_v60 = vpop.f32.mrf.mxu3 }
 0x62e   : > { %v3565_v31 = vadd.f32 %v1427_v60, %v1351_v22 }
 0x630   : > { %v1449_v25 = vmul.f32 -1.702, %v3565_v31 }
 0x632   : > { %v1458_v45 = vmul.f32 1.442695, %v1449_v25 }
 0x635   : > { %v1430_v61 = vpop.f32.mrf.mxu3 }
 0x636   : > { %v3563_v27 = vadd.f32 %v1430_v61, %v1356_v19 }
 0x638   : > { %v1450_v36 = vmul.f32 -1.702, %v3563_v27 }
 0x63a   : > { %v1460_v43 = vmul.f32 1.442695, %v1450_v36 }
 0x63d   : > { %v1433_v62 = vpop.f32.mrf.mxu3 }
 0x63e   : > { %v3559_v0 = vadd.f32 %v1433_v62, %v1361_v10  ;;  %v3097_v62 = vld [vmem:[%s3932_s2 + $0x8] sm:$0xff] }
 0x63f   : > { %1550 = vperm.xlu2 %2963, %v3097_v62  }
 0x640   : > { %v1451_v33 = vmul.f32 -1.702, %v3559_v0 }
 0x642   : > { %v1462_v40 = vmul.f32 1.442695, %v1451_v33 }
 0x645   : > { %v1436_v63 = vpop.f32.mrf.mxu3  ;;  %v1547_v42 = vpop.permute.xlu0 %1546 }
 0x646   : > { %v3556_v17 = vadd.f32 %v1436_v63, %v1366_v9 }
 0x648   : > { %v1452_v23 = vmul.f32 -1.702, %v3556_v17 }
 0x64a   : > { %v1464_v32 = vmul.f32 1.442695, %v1452_v23 }
 0x64d   : > { %v1439_v6 = vpop.f32.mrf.mxu3 }
 0x64e   : > { %v3552_v14 = vadd.f32 %v1439_v6, %v1371_v2 }
 0x650   : > { %v1453_v21 = vmul.f32 -1.702, %v3552_v14 }
 0x652   : > { %v1466_v11 = vmul.f32 1.442695, %v1453_v21  ;;  %v3098_v21 = vld [vmem:[%s3932_s2 + $0x18] sm:$0xff] }
 0x653   : > { %1558 = vperm.xlu2 %2963, %v3098_v21  }
 0x655   : > { %v1442_v12 = vpop.f32.mrf.mxu3 }
 0x656   : > { %v3554_v16 = vadd.f32 %v1442_v12, %v1376_v1 }
 0x658   : > { %v1454_v18 = vmul.f32 -1.702, %v3554_v16 }
 0x65a   : > { %v1468_v24 = vmul.f32 1.442695, %v1454_v18 }
 0x65c   : > { %3009 = vpow2.f32 %v1468_v24 }
 0x65d   : > { %v1445_v29 = vpop.f32.mrf.mxu3  ;;  %3011 = vpow2.f32 %v1466_v11  ;;  %v3124_v11 = vmov 18  }
 0x65e   : > { %v1446_v34 = vadd.f32 %v1445_v29, %v1381_v7  ;;  %3013 = vpow2.f32 %v1464_v32  ;;  %v3123_v29 = vmov 17   ;;  %2967 = vset.pattern.permute.xlu2 %v3124_v11 }
 0x65f   : > { %2965 = vset.pattern.permute.xlu1 %v3123_v29  ;;  %2966 = vset.pattern.permute.xlu0 %v3123_v29 }
 0x660   : > { %v1455_v37 = vmul.f32 -1.702, %v1446_v34  ;;  %1629 = vperm.xlu1 %2965, %v3098_v21   ;;  %1625 = vperm.xlu0 %2966, %v3096_v58  }
 0x661   : > { %1649 = vperm.xlu2 %2967, %v3098_v21  }
 0x662   : > { %v1470_v41 = vmul.f32 1.442695, %v1455_v37  ;;  %v3010_v44 = vpop.eup %3009 }
 0x663   : > { %v3012_v4 = vpop.eup %3011  ;;  %v1478_v5 = vadd.f32 1.0, %v3010_v44 }
 0x664   : > { %3015 = vpow2.f32 %v1470_v41  ;;  %v3014_v47 = vpop.eup %3013  ;;  %v1477_v49 = vadd.f32 1.0, %v3012_v4 }
 0x665   : > { %3017 = vpow2.f32 %v1462_v40  ;;  %v1476_v53 = vadd.f32 1.0, %v3014_v47 }
 0x666   : > { %3019 = vpow2.f32 %v1460_v43  ;;  %v1555_v43 = vpop.permute.xlu1 %1554 }
 0x667   : > { %3021 = vpow2.f32 %v1458_v45 }
 0x668   : > { %3023 = vpow2.f32 %v1456_v3  ;;  %1621 = vperm.xlu1 %2965, %v3097_v62   ;;  %2968 = vset.pattern.permute.xlu0 %v3124_v11 }
 0x669   : > { %3025 = vrcp.f32 %v1478_v5  ;;  %1641 = vperm.xlu0 %2968, %v3097_v62   ;;  %1645 = vperm.xlu2 %2967, %v3096_v58  }
 0x66a   : > { %v3016_v48 = vpop.eup %3015 }
 0x66b   : > { %v1479_v50 = vadd.f32 1.0, %v3016_v48  ;;  %v3018_v52 = vpop.eup %3017 }
 0x66c   : > { %v3020_v55 = vpop.eup %3019  ;;  %v1475_v8 = vadd.f32 1.0, %v3018_v52 }
 0x66d   : > { %3027 = vrcp.f32 %v1479_v50  ;;  %v3022_v59 = vpop.eup %3021  ;;  %v1474_v61 = vadd.f32 1.0, %v3020_v55 }
 0x66e   : > { %3029 = vrcp.f32 %v1477_v49  ;;  %v3024_v60 = vpop.eup %3023  ;;  %v1473_v2 = vadd.f32 1.0, %v3022_v59 }
 0x66f   : > { %3031 = vrcp.f32 %v1476_v53  ;;  %v3026_v63 = vpop.eup %3025  ;;  %v1472_v9 = vadd.f32 1.0, %v3024_v60 }
 0x670   : > { %3033 = vrcp.f32 %v1475_v8  ;;  %v1494_v10 = vmul.f32 %v3026_v63, %v3554_v16  ;;  %1617 = vperm.xlu1 %2965, %v3095_v57  }
 0x671   : > { %3035 = vrcp.f32 %v1474_v61  ;;  %1637 = vperm.xlu2 %2967, %v3095_v57  }
 0x672   : > { %3037 = vrcp.f32 %v1473_v2 }
 0x673   : > { %v3028_v1 = vpop.eup %3027  ;;  %3039 = vrcp.f32 %v1472_v9 }
 0x674   : > { %v1495_v6 = vmul.f32 %v3028_v1, %v1446_v34  ;;  %v3030_v7 = vpop.eup %3029  ;;  %v1499_v34 = vld [vmem:[%s3936_s6 + $0x18] sm:$0xff] }
 0x675   : > { %v3032_v12 = vpop.eup %3031  ;;  %v1493_v18 = vmul.f32 %v3030_v7, %v3552_v14 }
 0x676   : > { %1520 = vmatpush.msrb.mxu0 %v1495_v6  ;;  %v3034_v19 = vpop.eup %3033  ;;  %v1492_v22 = vmul.f32 %v3032_v12, %v3556_v17 }
 0x677   : > { %v3036_v23 = vpop.eup %3035  ;;  %v1491_v24 = vmul.f32 %v3034_v19, %v3559_v0  ;;  %v1496_v0 = vld [vmem:[%s3936_s6] sm:$0xff] }
 0x678   : > { %1521 = vmatpush.msrb.mxu0 %v1494_v10  ;;  %v3038_v16 = vpop.eup %3037  ;;  %v1490_v26 = vmul.f32 %v3036_v23, %v3563_v27  ;;  %v1497_v27 = vld [vmem:[%s3936_s6 + $0x8] sm:$0xff] }
 0x679   : > { %v3040_v14 = vpop.eup %3039  ;;  %v1489_v33 = vmul.f32 %v3038_v16, %v3565_v31  ;;  %v1498_v31 = vld [vmem:[%s3936_s6 + $0x10] sm:$0xff] }
 0x67a   : > { %1522 = vmatpush.msrb.mxu0 %v1493_v18  ;;  %v1488_v17 = vmul.f32 %v3040_v14, %v3568_v35  ;;  %v3125_v14 = vmov 19  }
 0x67b   : > { %2969 = vset.pattern.permute.xlu1 %v3125_v14  ;;  %2970 = vset.pattern.permute.xlu2 %v3125_v14 }
 0x67c   : > { %1523 = vmatpush.msrb.mxu0 %v1492_v22  ;;  %1683 = vperm.xlu1 %2969, %v3505_v13  }
 0x67d   : > { %1688 = vperm.xlu2 %2970, %v3529_v54   ;;  %2971 = vset.pattern.permute.xlu0 %v3125_v14 }
 0x67e   : > { %1524 = vmatpush.msrb.mxu0 %v1491_v24 }
 0x680   : > { %1525 = vmatpush.msrb.mxu0 %v1490_v26 }
 0x682   : > { %1526 = vmatpush.msrb.mxu0 %v1489_v33 }
 0x684   : > { %1527 = vmatpush.msrb.mxu0 %v1488_v17  ;;  %1693 = vperm.xlu1 %2969, %v3515_v51  }
 0x685   : > { %2823 = vmatmul.msk.f32.vlgmr.msrb.gmra.mxu0 %vm358_vm0, %v1496_v0 }
 0x68c   : > { %1708 = vperm.xlu1 %2969, %v3366_v28  }
 0x68d   : > { %2824 = vmatmul.msk.f32.gmra.mxu0 %vm358_vm0, %v1497_v27 }
 0x694   : > { %1718 = vperm.xlu1 %2969, %v3376_v30   ;;  %v2828_v30 = vld [vmem:[%s3933_s3 + $0x68] sm:$0xff] }
 0x695   : > { %2825 = vmatmul.msk.f32.gmra.mxu0 %vm358_vm0, %v1498_v31 }
 0x699   : > { %v1551_v37 = vpop.permute.xlu2 %1550 }
 0x69d   : > { %2826 = vmatmul.msk.f32.gmra.mxu0 %vm358_vm0, %v1499_v34 }
 0x6ad   : > { %v1559_v48 = vpop.permute.xlu2 %1558 }
 0x6bb   : > { %v1650_v34 = vpop.permute.xlu2 %1649 }
 0x6d2   : > { %v1630_v0 = vpop.permute.xlu1 %1629 }
 0x702   : > { %v1529_v35 = vpop.f32.mrf.mxu0 }
 0x703   : > { %v1541_v40 = vadd.f32 %v1529_v35, %v3471_v20 }
 0x705   : > { %v3613_v45 = vadd.f32 %v1547_v42, %v1541_v40  ;;  %v1646_v42 = vpop.permute.xlu2 %1645 }
 0x70a   : > { %v1532_v32 = vpop.f32.mrf.mxu0 }
 0x70b   : > { %v1542_v36 = vadd.f32 %v1532_v32, %v3468_v38  ;;  %v1565_v38 = vsel %vm429_vm1, %v3613_v45, 0.0 }
 0x70d   : > { %v3611_v44 = vadd.f32 %v1551_v37, %v1542_v36  ;;  %v1622_v37 = vpop.permute.xlu1 %1621 }
 0x70f   : > { %v1566_v4 = vsel %vm429_vm1, %v3611_v44, 0.0 }
 0x710   : > { %v1567_v47 = vadd.f32 %v1566_v4, %v1565_v38 }
 0x712   : > { %v1535_v25 = vpop.f32.mrf.mxu0 }
 0x713   : > { %v1543_v41 = vadd.f32 %v1535_v25, %v3474_v39  ;;  %v1626_v25 = vpop.permute.xlu0 %1625 }
 0x715   : > { %v3615_v3 = vadd.f32 %v1555_v43, %v1543_v41 }
 0x717   : > { %v1568_v20 = vsel %vm429_vm1, %v3615_v3, 0.0 }
 0x718   : > { %v1569_v50 = vadd.f32 %v1568_v20, %v1567_v47 }
 0x71a   : > { %v1538_v5 = vpop.f32.mrf.mxu0 }
 0x71b   : > { %v1544_v39 = vadd.f32 %v1538_v5, %v3483_v46 }
 0x71d   : > { %v3624_v49 = vadd.f32 %v1559_v48, %v1544_v39  ;;  %v1618_v48 = vpop.permute.xlu1 %1617 }
 0x71f   : > { %v1570_v52 = vsel %vm429_vm1, %v3624_v49, 0.0 }
 0x720   : > { %v1571_v53 = vadd.f32 %v1570_v52, %v1569_v50  ;;  %v1642_v50 = vpop.permute.xlu0 %1641 }
 0x722   : > { %v1572_v55 = vrot.slane %v1571_v53, 4 }
 0x724   : > { %v1573_v56 = vadd.f32 %v1572_v55, %v1571_v53 }
 0x726   : > { %v1574_v8 = vrot.slane %v1573_v56, 2 }
 0x728   : > { %v1575_v57 = vadd.f32 %v1574_v8, %v1573_v56  ;;  %v1638_v56 = vpop.permute.xlu2 %1637 }
 0x72a   : > { %v1576_v58 = vrot.slane %v1575_v57, 1 }
 0x72c   : > { %v1577_v59 = vadd.f32 %v1576_v58, %v1575_v57  ;;  %v2827_v57 = vld [vmem:[%s3933_s3 + $0x60] sm:$0xff]  ;;  %v3654_v58 = vld [vmem:[%s3932_s2 + $0x18] sm:$0xff] }
 0x72d   : > { %1698 = vperm.xlu2 %2970, %v3654_v58  }
 0x72e   : > { %v1578_v60 = vmul.f32 %v1577_v59, %v3294_v15  ;;  %v2829_v59 = vld [vmem:[%s3933_s3 + $0x70] sm:$0xff] }
 0x730   : > { %v1579_v61 = vsub.f32 %v3613_v45, %v1578_v60  ;;  %v1580_v46 = vsub.f32 %v3611_v44, %v1578_v60  ;;  %v1581_v62 = vsub.f32 %v3615_v3, %v1578_v60  ;;  %v1582_v63 = vsub.f32 %v3624_v49, %v1578_v60  ;;  %v3664_v60 = vld [vmem:[%s3932_s2 + $0x20] sm:$0xff] }
 0x731   : > { %1703 = vperm.xlu0 %2971, %v3664_v60  }
 0x732   : > { %v1583_v1 = vmul.f32 %v1579_v61, %v1579_v61  ;;  %v1584_v2 = vmul.f32 %v1580_v46, %v1580_v46  ;;  %v1585_v6 = vmul.f32 %v1581_v62, %v1581_v62  ;;  %v1586_v7 = vmul.f32 %v1582_v63, %v1582_v63 }
 0x734   : > { %v1587_v9 = vsel %vm429_vm1, %v1583_v1, 0.0  ;;  %v1588_v10 = vsel %vm429_vm1, %v1584_v2, 0.0  ;;  %v1590_v18 = vsel %vm429_vm1, %v1585_v6, 0.0  ;;  %v1592_v21 = vsel %vm429_vm1, %v1586_v7, 0.0  ;;  %v2833_v1 = vld [vmem:[%s3933_s3 + $0x90] sm:$0xff]  ;;  %v2834_v2 = vld [vmem:[%s3933_s3 + $0x98] sm:$0xff]  ;;  %v1684_v6 = vpop.permute.xlu1 %1683 }
 0x735   : > { %v1589_v12 = vadd.f32 %v1588_v10, %v1587_v9  ;;  %v1689_v10 = vpop.permute.xlu2 %1688 }
 0x737   : > { %v1591_v19 = vadd.f32 %v1590_v18, %v1589_v12 }
 0x739   : > { %v1593_v22 = vadd.f32 %v1592_v21, %v1591_v19 }
 0x73b   : > { %v1594_v23 = vrot.slane %v1593_v22, 4 }
 0x73c   : > { %v1694_v19 = vpop.permute.xlu1 %1693 }
 0x73d   : > { %v1595_v24 = vadd.f32 %v1594_v23, %v1593_v22 }
 0x73f   : > { %v1596_v16 = vrot.slane %v1595_v24, 2 }
 0x741   : > { %v1597_v26 = vadd.f32 %v1596_v16, %v1595_v24 }
 0x743   : > { %v1598_v29 = vrot.slane %v1597_v26, 1 }
 0x745   : > { %v1599_v33 = vadd.f32 %v1598_v29, %v1597_v26 }
 0x747   : > { %v1600_v11 = vmul.f32 %v1599_v33, %v3294_v15  ;;  %v1709_v33 = vpop.permute.xlu1 %1708 }
 0x749   : > { %v1601_v17 = vadd.f32 1e-05, %v1600_v11 }
 0x74b   : > { %3041 = vrsqrt.f32 %v1601_v17  ;;  %vm1608_vm2 = vweird.f32 %v1601_v17 }
 0x751   : > { %v3042_v27 = vpop.eup %3041 }
 0x752   : > { %v1603_v31 = vmul.f32 %v3042_v27, %v1601_v17  ;;  %vm1609_vm15 = vweird.f32 %v3042_v27 }
 0x753   : > { %vm1610_vm3 = vmor %vm1608_vm2, %vm1609_vm15 }
 0x754   : > { %v1604_v35 = vmul.f32 %v3042_v27, %v1603_v31 }
 0x756   : > { %v1605_v32 = vmul.f32 0.5, %v1604_v35  ;;  %v1719_v35 = vpop.permute.xlu1 %1718 }
 0x758   : > { %v1606_v36 = vsub.f32 1.5, %v1605_v32 }
 0x75a   : > { %v1607_v40 = vmul.f32 %v3042_v27, %v1606_v36 }
 0x75c   : > { %v1611_v41 = vsel %vm1610_vm3, %v3042_v27, %v1607_v40 }
 0x75d   : > { %v1615_v43 = vmul.f32 %v1611_v41, %v1582_v63  ;;  %v1613_v4 = vmul.f32 %v1611_v41, %v1580_v46  ;;  %v1614_v5 = vmul.f32 %v1611_v41, %v1581_v62  ;;  %v1612_v20 = vmul.f32 %v1611_v41, %v1579_v61  ;;  %v3669_v61 = vld [vmem:[%s3932_s2 + $0x30] sm:$0xff]  ;;  %v2830_v46 = vld [vmem:[%s3933_s3 + $0x78] sm:$0xff]  ;;  %v2831_v62 = vld [vmem:[%s3933_s3 + $0x80] sm:$0xff] }
 0x75e   : > { %1713 = vperm.xlu2 %2970, %v3669_v61   ;;  %v2832_v63 = vld [vmem:[%s3933_s3 + $0x88] sm:$0xff]  ;;  %v2835_v41 = vld [vmem:[%s3933_s3 + $0xa0] sm:$0xff] }
 0x75f   : > { %v1635_v38 = vmul.f32 %v1630_v0, %v1615_v43  ;;  %v1634_v39 = vmul.f32 %v1626_v25, %v1614_v5  ;;  %v1633_v28 = vmul.f32 %v1622_v37, %v1613_v4  ;;  %v1632_v52 = vmul.f32 %v1618_v48, %v1612_v20  ;;  %v2836_v48 = vld [vmem:[%s3933_s3 + $0xa8] sm:$0xff] }
 0x761   : > { %v1655_v47 = vadd.f32 %v1650_v34, %v1635_v38  ;;  %v1654_v53 = vadd.f32 %v1646_v42, %v1634_v39  ;;  %v1653_v55 = vadd.f32 %v1642_v50, %v1633_v28  ;;  %v1652_v8 = vadd.f32 %v1638_v56, %v1632_v52  ;;  %v1677_v28 = vld [vmem:[%s3932_s2 + $0x40] sm:$0xff]  ;;  %v2837_v50 = vld [vmem:[%s3933_s3 + $0xb0] sm:$0xff]  ;;  %v2838_v52 = vld [vmem:[%s3933_s3 + $0xb8] sm:$0xff] }
 0x763   : > { %1789 = vmatpush.msrb.mxu1 %v1655_v47 }
 0x765   : > { %1790 = vmatpush.msrb.mxu1 %v1654_v53 }
 0x767   : > { %1791 = vmatpush.msrb.mxu1 %v1653_v55 }
 0x769   : > { %1792 = vmatpush.msrb.mxu1 %v1652_v8 }
 0x76a   : > { %2839 = vmatmul.msk.f32.vlgmr.msrb.gmra.mxu1 %vm703_vm9, %v2827_v57 }
 0x772   : > { %2840 = vmatmul.msk.f32.gmra.mxu1 %vm703_vm9, %v2828_v30 }
 0x77a   : > { %2841 = vmatmul.msk.f32.gmra.mxu1 %vm703_vm9, %v2829_v59 }
 0x782   : > { %2842 = vmatmul.msk.f32.gmra.mxu1 %vm703_vm9, %v2830_v46 }
 0x787   : > { %v1699_v23 = vpop.permute.xlu2 %1698 }
 0x78a   : > { %2843 = vmatmul.msk.f32.gmra.mxu1 %vm703_vm9, %v2831_v62 }
 0x792   : > { %2844 = vmatmul.msk.f32.gmra.mxu1 %vm703_vm9, %v2832_v63 }
 0x79a   : > { %2845 = vmatmul.msk.f32.gmra.mxu1 %vm703_vm9, %v2833_v1 }
 0x7a2   : > { %2846 = vmatmul.msk.f32.gmra.mxu1 %vm703_vm9, %v2834_v2 }
 0x7a3   : > { %v1704_v26 = vpop.permute.xlu0 %1703 }
 0x7aa   : > { %2847 = vmatmul.msk.f32.gmra.mxu1 %vm703_vm9, %v2835_v41 }
 0x7b2   : > { %2848 = vmatmul.msk.f32.gmra.mxu1 %vm703_vm9, %v2836_v48  ;;  %v3127_v48 = vmov 21  }
 0x7b8   : > { %v1714_v0 = vpop.permute.xlu2 %1713 }
 0x7ba   : > { %2849 = vmatmul.msk.f32.gmra.mxu1 %vm703_vm9, %v2837_v50 }
 0x7c2   : > { %2850 = vmatmul.msk.f32.gmra.mxu1 %vm703_vm9, %v2838_v52 }
 0x7e7   : > { %v1794_v7 = vpop.f32.mrf.mxu1 }
 0x7e8   : > { %v1795_v9 = vadd.f32 %v1794_v7, %v1684_v6 }
 0x7ea   : > { %1830 = vxpose.xlu0.b32.start.end [1/1] (short) (narrow) %v1795_v9, 8 }
 0x7ef   : > { %v1797_v12 = vpop.f32.mrf.mxu1 }
 0x7f0   : > { %v1798_v18 = vadd.f32 %v1797_v12, %v1689_v10 }
 0x7f2   : > { %1862 = vxpose.xlu2.b32.start.end [1/1] (short) (narrow) %v1798_v18, 8  ;;  %v3099_v18 = vld [vmem:[%s3932_s2 + $0x48] sm:$0xff] }
 0x7f7   : > { %v1800_v21 = vpop.f32.mrf.mxu1 }
 0x7f8   : > { %v1801_v22 = vadd.f32 %v1800_v21, %v1694_v19 }
 0x7fa   : > { %1894 = vxpose.xlu1.b32.start.end [1/1] (short) (narrow) %v1801_v22, 8 }
 0x7ff   : > { %v1803_v24 = vpop.f32.mrf.mxu1 }
 0x800   : > { %v1804_v16 = vadd.f32 %v1803_v24, %v1699_v23  ;;  %v1680_v23 = vld [vmem:[%s3932_s2 + $0x58] sm:$0xff]  ;;  %v1679_v24 = vld [vmem:[%s3932_s2 + $0x50] sm:$0xff] }
 0x802   : > { %1926 = vxpose.xlu0.b32.start.end [1/1] (short) (narrow) %v1804_v16, 8 }
 0x807   : > { %v1806_v29 = vpop.f32.mrf.mxu1 }
 0x808   : > { %v1807_v14 = vadd.f32 %v1806_v29, %v1704_v26 }
 0x80a   : > { %1976 = vmatpush.msra.mxu0 %v1807_v14 }
 0x80f   : > { %v1809_v11 = vpop.f32.mrf.mxu1 }
 0x810   : > { %v1810_v17 = vadd.f32 %v1809_v11, %v1709_v33 }
 0x812   : > { %1999 = vmatpush.msrb.mxu0 %v1810_v17 }
 0x817   : > { %v1812_v27 = vpop.f32.mrf.mxu1 }
 0x818   : > { %v1813_v31 = vadd.f32 %v1812_v27, %v1714_v0 }
 0x81a   : > { %2022 = vmatpush.msrb.mxu2 %v1813_v31 }
 0x81f   : > { %v1815_v34 = vpop.f32.mrf.mxu1 }
 0x820   : > { %v1816_v32 = vadd.f32 %v1815_v34, %v1719_v35 }
 0x827   : > { %v1818_v29 = vpop.f32.mrf.mxu1 }
 0x82f   : > { %v1821_v0 = vpop.f32.mrf.mxu1 }
 0x88b   : > { %v1878_v37 = vpop.trf.xlu2 }
 0x88e   : > { %v1846_v36 = vpop.trf.xlu0 }
 0x88f   : > { %2851 = vmatmul.msk.f32.vlgmr.msra.gmra.mxu0 %vm921_vm10, %v1846_v36 }
 0x890   : > { %2045 = vmatpush.msra.mxu0 %v1816_v32  ;;  %v1824_v32 = vpop.f32.mrf.mxu1 }
 0x897   : > { %2852 = vmatmul.msk.f32.vlgmr.msrb.gmra.mxu0 %vm921_vm10, %v1878_v37 }
 0x89e   : > { %v1910_v25 = vpop.trf.xlu1 }
 0x89f   : > { %2853 = vmatmul.msk.f32.vlgmr.msrb.gmra.mxu2 %vm921_vm10, %v1910_v25 }
 0x8a6   : > { %v1942_v40 = vpop.trf.xlu0 }
 0x8a7   : > { %2854 = vmatmul.msk.f32.vlgmr.msra.gmra.mxu0 %vm921_vm10, %v1942_v40 }
 0x90c   : > { %v1978_v42 = vpop.f32.mrf.mxu0 }
 0x90d   : > { %v2050_v43 = vsel %vm1014_vm11, %v1978_v42, -inf }
 0x90e   : > { %2051 = vmax.xlane.f32.xlu2 %v2050_v43  ;;  %v1827_v43 = vpop.f32.mrf.mxu1 }
 0x914   : > { %v2001_v4 = vpop.f32.mrf.mxu0 }
 0x915   : > { %v2053_v5 = vsel %vm1014_vm11, %v2001_v4, -inf }
 0x916   : > { %2054 = vmax.xlane.f32.xlu2 %v2053_v5 }
 0x922   : > { %v2024_v38 = vpop.f32.mrf.mxu2 }
 0x923   : > { %v2056_v20 = vsel %vm1014_vm11, %v2024_v38, -inf }
 0x924   : > { %2057 = vmax.xlane.f32.xlu1 %v2056_v20  ;;  %v2047_v39 = vpop.f32.mrf.mxu0 }
 0x925   : > { %v2059_v47 = vsel %vm1014_vm11, %v2047_v39, -inf }
 0x926   : > { %2060 = vmax.xlane.f32.xlu0 %v2059_v47 }
 0x93a   : > { %1723 = vperm.xlu0 %2971, %v1677_v28  }
 0x981   : > { %v2052_v53 = vpop.xlane.xlu2 %2051 }
 0x982   : > { %v2062_v55 = vsub.f32 %v1978_v42, %v2052_v53  ;;  %v3128_v53 = vmov 22  }
 0x984   : > { %v2066_v56 = vmul.f32 1.442695, %v2062_v55  ;;  %v2863_v55 = vld [vmem:[%s3934_s4 + $0x20] sm:$0xff] }
 0x986   : > { %3043 = vpow2.f32 %v2066_v56  ;;  %v2864_v56 = vld [vmem:[%s3934_s4 + $0x28] sm:$0xff] }
 0x989   : > { %v2055_v8 = vpop.xlane.xlu2 %2054 }
 0x98a   : > { %v2063_v57 = vsub.f32 %v2001_v4, %v2055_v8  ;;  %v2865_v8 = vld [vmem:[%s3934_s4 + $0x30] sm:$0xff] }
 0x98c   : > { %v3044_v30 = vpop.eup %3043  ;;  %v2068_v59 = vmul.f32 1.442695, %v2063_v57 }
 0x98d   : > { %v2074_v46 = vsel %vm1014_vm11, %v3044_v30, 0.0 }
 0x98e   : > { %3045 = vpow2.f32 %v2068_v59  ;;  %2075 = vadd.xlane.f32.xlu0 %v2074_v46 }
 0x994   : > { %v3046_v62 = vpop.eup %3045 }
 0x995   : > { %v2077_v63 = vsel %vm1014_vm11, %v3046_v62, 0.0 }
 0x996   : > { %2078 = vadd.xlane.f32.xlu1 %v2077_v63 }
 0x997   : > { %v2058_v1 = vpop.xlane.xlu1 %2057 }
 0x998   : > { %v2064_v2 = vsub.f32 %v2024_v38, %v2058_v1 }
 0x999   : > { %v2061_v6 = vpop.xlane.xlu0 %2060 }
 0x99a   : > { %v2070_v7 = vmul.f32 1.442695, %v2064_v2  ;;  %v2065_v9 = vsub.f32 %v2047_v39, %v2061_v6  ;;  %v3126_v39 = vmov 20  }
 0x99c   : > { %3047 = vpow2.f32 %v2070_v7  ;;  %v2072_v10 = vmul.f32 1.442695, %v2065_v9 }
 0x99e   : > { %3049 = vpow2.f32 %v2072_v10 }
 0x9a2   : > { %v3048_v12 = vpop.eup %3047  ;;  %1728 = vperm.xlu0 %2971, %v3099_v18  }
 0x9a3   : > { %v2080_v19 = vsel %vm1014_vm11, %v3048_v12, 0.0 }
 0x9a4   : > { %v3050_v21 = vpop.eup %3049  ;;  %2081 = vadd.xlane.f32.xlu2 %v2080_v19 }
 0x9a5   : > { %v2083_v22 = vsel %vm1014_vm11, %v3050_v21, 0.0 }
 0x9a6   : > { %2084 = vadd.xlane.f32.xlu1 %v2083_v22 }
 0x9aa   : > { %2972 = vset.pattern.permute.xlu0 %v3126_v39 }
 0x9ab   : > { %2209 = vperm.xlu0 %2972, %v3505_v13  }
 0x9ac   : > { %v1724_v16 = vpop.permute.xlu0 %1723 }
 0x9ad   : > { %v1819_v17 = vadd.f32 %v1818_v29, %v1724_v16 }
 0x9b3   : > { %2976 = vset.pattern.permute.xlu0 %v3127_v48 }
 0x9b4   : > { %2332 = vperm.xlu0 %2976, %v3515_v51  }
 0x9bc   : > { %1738 = vperm.xlu2 %2970, %v1680_v23   ;;  %2978 = vset.pattern.permute.xlu0 %v3128_v53 }
 0x9bd   : > { %2348 = vperm.xlu0 %2978, %v3529_v54  }
 0x9bf   : > { %1733 = vperm.xlu1 %2969, %v1679_v24  }
 0x9c4   : > { %2973 = vset.pattern.permute.xlu2 %v3126_v39 }
 0x9c5   : > { %2214 = vperm.xlu2 %2973, %v3529_v54  }
 0x9c7   : > { %2974 = vset.pattern.permute.xlu1 %v3126_v39 }
 0x9c8   : > { %2219 = vperm.xlu1 %2974, %v3515_v51  }
 0x9cd   : > { %2224 = vperm.xlu2 %2973, %v3654_v58  }
 0x9d0   : > { %2975 = vset.pattern.permute.xlu1 %v3127_v48  ;;  %v2379_v48 = vld [vmem:[%s3932_s2 + $0x38] sm:$0xff] }
 0x9d1   : > { %2336 = vperm.xlu1 %2975, %v3654_v58  }
 0x9d5   : > { %2977 = vset.pattern.permute.xlu2 %v3128_v53 }
 0x9d6   : > { %2356 = vperm.xlu2 %2977, %v3654_v58  }
 0x9d9   : > { %2328 = vperm.xlu1 %2975, %v3529_v54   ;;  %v2866_v54 = vld [vmem:[%s3934_s4 + $0x38] sm:$0xff] }
 0x9de   : > { %2352 = vperm.xlu2 %2977, %v3515_v51  }
 0x9e1   : > { %2324 = vperm.xlu1 %2975, %v3505_v13  }
 0x9e6   : > { %2344 = vperm.xlu2 %2977, %v3505_v13  }
 0xa01   : > { %v2076_v26 = vpop.xlane.xlu0 %2075 }
 0xa02   : > { %3051 = vrcp.f32 %v2076_v26 }
 0xa08   : > { %v3052_v14 = vpop.eup %3051 }
 0xa09   : > { %v2090_v33 = vmul.f32 %v3052_v14, %v3044_v30  ;;  %v2079_v11 = vpop.xlane.xlu1 %2078 }
 0xa0a   : > { %3053 = vrcp.f32 %v2079_v11 }
 0xa0b   : > { %2855 = vmatpush.xpose.msk.msra.mxu2 %vm429_vm1, %v2090_v33 }
 0xa0e   : > { %2856 = vmatmul.msk.f32.vlgmr.msra.gmra.mxu2 %vm429_vm1, %v1819_v17 }
 0xa10   : > { %v3054_v27 = vpop.eup %3053 }
 0xa11   : > { %v2091_v31 = vmul.f32 %v3054_v27, %v3046_v62 }
 0xa13   : > { %2857 = vmatpush.xpose.msk.msrb.mxu0 %vm429_vm1, %v2091_v31 }
 0xa14   : > { %v1729_v34 = vpop.permute.xlu0 %1728 }
 0xa15   : > { %v1822_v35 = vadd.f32 %v1821_v0, %v1729_v34 }
 0xa17   : > { %2858 = vmatmul.msk.f32.vlgmr.msrb.gmra.mxu0 %vm429_vm1, %v1822_v35  ;;  %v2082_v36 = vpop.xlane.xlu2 %2081 }
 0xa18   : > { %3055 = vrcp.f32 %v2082_v36 }
 0xa19   : > { %v2085_v37 = vpop.xlane.xlu1 %2084 }
 0xa1a   : > { %3057 = vrcp.f32 %v2085_v37 }
 0xa1d   : > { %v2210_v46 = vpop.permute.xlu0 %2209 }
 0xa1e   : > { %v3056_v25 = vpop.eup %3055 }
 0xa1f   : > { %v2092_v40 = vmul.f32 %v3056_v25, %v3048_v12  ;;  %v1739_v4 = vpop.permute.xlu2 %1738 }
 0xa20   : > { %v3058_v41 = vpop.eup %3057  ;;  %v1828_v5 = vadd.f32 %v1827_v43, %v1739_v4 }
 0xa21   : > { %v2093_v42 = vmul.f32 %v3058_v41, %v3050_v21  ;;  %2859 = vmatpush.xpose.msk.msrb.mxu2 %vm429_vm1, %v2092_v40 }
 0xa23   : > { %2861 = vmatpush.xpose.msk.msrb.mxu3 %vm429_vm1, %v2093_v42 }
 0xa26   : > { %2862 = vmatmul.msk.f32.vlgmr.msrb.gmra.mxu3 %vm429_vm1, %v1828_v5 }
 0xa27   : > { %v2215_v59 = vpop.permute.xlu2 %2214 }
 0xa2f   : > { %v2225_v18 = vpop.permute.xlu2 %2224 }
 0xa31   : > { %v1734_v38 = vpop.permute.xlu1 %1733 }
 0xa32   : > { %v1825_v20 = vadd.f32 %v1824_v32, %v1734_v38 }
 0xa34   : > { %2860 = vmatmul.msk.f32.vlgmr.msrb.gmra.mxu2 %vm429_vm1, %v1825_v20 }
 0xa3a   : > { %v2220_v62 = vpop.permute.xlu1 %2219 }
 0xa91   : > { %v2117_v28 = vpop.f32.mrf.mxu2 }
 0xa94   : > { %v2143_v52 = vpop.f32.mrf.mxu0 }
 0xaa9   : > { %v2195_v47 = vpop.f32.mrf.mxu3 }
 0xaaa   : > { %2251 = vmatpush.msra.mxu0 %v2195_v47 }
 0xab7   : > { %v2169_v50 = vpop.f32.mrf.mxu2 }
 0xab8   : > { %2252 = vmatpush.msra.mxu0 %v2169_v50 }
 0xaba   : > { %2253 = vmatpush.msra.mxu0 %v2143_v52 }
 0xabc   : > { %2254 = vmatpush.msra.mxu0 %v2117_v28  ;;  %v3129_v28 = vmov 23  }
 0xabd   : > { %2867 = vmatmul.msk.f32.vlgmr.msra.gmra.mxu0 %vm703_vm9, %v2863_v55  ;;  %2979 = vset.pattern.permute.xlu1 %v3129_v28  ;;  %v2377_v55 = vld [vmem:[%s3932_s2 + $0x28] sm:$0xff] }
 0xabe   : > { %2980 = vset.pattern.permute.xlu2 %v3129_v28  ;;  %2417 = vperm.xlu1 %2979, %v2379_v48  }
 0xabf   : > { %2412 = vperm.xlu2 %2980, %v3669_v61   ;;  %2981 = vset.pattern.permute.xlu0 %v3129_v28 }
 0xac0   : > { %2402 = vperm.xlu0 %2981, %v3664_v60  }
 0xac5   : > { %2868 = vmatmul.msk.f32.gmra.mxu0 %vm703_vm9, %v2864_v56  ;;  %v2337_v56 = vpop.permute.xlu1 %2336 }
 0xac6   : > { %2407 = vperm.xlu1 %2979, %v2377_v55  }
 0xac7   : > { %2397 = vperm.xlu2 %2980, %v3654_v58  }
 0xacd   : > { %2869 = vmatmul.msk.f32.gmra.mxu0 %vm703_vm9, %v2865_v8 }
 0xace   : > { %2392 = vperm.xlu1 %2979, %v3515_v51  }
 0xad5   : > { %2870 = vmatmul.msk.f32.gmra.mxu0 %vm703_vm9, %v2866_v54 }
 0xb3a   : > { %v2256_v57 = vpop.f32.mrf.mxu0 }
 0xb3b   : > { %v2257_v2 = vadd.f32 %v2256_v57, %v2210_v46  ;;  %v2357_v57 = vpop.permute.xlu2 %2356  ;;  %v2333_v46 = vpop.permute.xlu0 %2332 }
 0xb3d   : > { %v3773_v13 = vadd.f32 %v2257_v2, %v3613_v45 }
 0xb3f   : > { %v2272_v19 = vsel %vm429_vm1, %v3773_v13, 0.0 }
 0xb42   : > { %v2259_v30 = vpop.f32.mrf.mxu0 }
 0xb43   : > { %v2260_v63 = vadd.f32 %v2259_v30, %v2215_v59  ;;  %v2329_v59 = vpop.permute.xlu1 %2328  ;;  %v2353_v2 = vpop.permute.xlu2 %2352 }
 0xb45   : > { %v3770_v7 = vadd.f32 %v2260_v63, %v3611_v44  ;;  %v2372_v63 = vld [vmem:[%s3932_s2] sm:$0xff] }
 0xb46   : > { %2382 = vperm.xlu1 %2979, %v2372_v63  }
 0xb47   : > { %v2273_v10 = vsel %vm429_vm1, %v3770_v7, 0.0 }
 0xb48   : > { %v2274_v44 = vadd.f32 %v2273_v10, %v2272_v19 }
 0xb4a   : > { %v2262_v1 = vpop.f32.mrf.mxu0 }
 0xb4b   : > { %v2263_v6 = vadd.f32 %v2262_v1, %v2220_v62 }
 0xb4d   : > { %v3776_v9 = vadd.f32 %v2263_v6, %v3615_v3 }
 0xb4f   : > { %v2275_v21 = vsel %vm429_vm1, %v3776_v9, 0.0 }
 0xb50   : > { %v2276_v45 = vadd.f32 %v2275_v21, %v2274_v44  ;;  %v2325_v44 = vpop.permute.xlu1 %2324 }
 0xb52   : > { %v2265_v12 = vpop.f32.mrf.mxu0 }
 0xb53   : > { %v2266_v22 = vadd.f32 %v2265_v12, %v2225_v18 }
 0xb55   : > { %v3785_v23 = vadd.f32 %v2266_v22, %v3624_v49 }
 0xb57   : > { %v2277_v3 = vsel %vm429_vm1, %v3785_v23, 0.0 }
 0xb58   : > { %v2278_v24 = vadd.f32 %v2277_v3, %v2276_v45  ;;  %v2349_v45 = vpop.permute.xlu0 %2348 }
 0xb5a   : > { %v2279_v16 = vrot.slane %v2278_v24, 4 }
 0xb5c   : > { %v2280_v26 = vadd.f32 %v2279_v16, %v2278_v24 }
 0xb5e   : > { %v2281_v29 = vrot.slane %v2280_v26, 2 }
 0xb60   : > { %v2282_v14 = vadd.f32 %v2281_v29, %v2280_v26  ;;  %v2345_v26 = vpop.permute.xlu2 %2344 }
 0xb62   : > { %v2283_v33 = vrot.slane %v2282_v14, 1 }
 0xb64   : > { %v2284_v11 = vadd.f32 %v2283_v33, %v2282_v14  ;;  %v2871_v14 = vld [vmem:[%s3935_s5 + $0x40] sm:$0xff]  ;;  %v2872_v33 = vld [vmem:[%s3935_s5 + $0x48] sm:$0xff] }
 0xb66   : > { %v2285_v17 = vmul.f32 %v2284_v11, %v3294_v15  ;;  %v2873_v11 = vld [vmem:[%s3935_s5 + $0x50] sm:$0xff] }
 0xb68   : > { %v2286_v0 = vsub.f32 %v3773_v13, %v2285_v17  ;;  %v2287_v27 = vsub.f32 %v3770_v7, %v2285_v17  ;;  %v2288_v49 = vsub.f32 %v3776_v9, %v2285_v17  ;;  %v2289_v31 = vsub.f32 %v3785_v23, %v2285_v17  ;;  %v2373_v17 = vld [vmem:[%s3932_s2 + $0x8] sm:$0xff] }
 0xb69   : > { %2387 = vperm.xlu2 %2980, %v2373_v17  }
 0xb6a   : > { %v2290_v34 = vmul.f32 %v2286_v0, %v2286_v0  ;;  %v2291_v35 = vmul.f32 %v2287_v27, %v2287_v27  ;;  %v2292_v32 = vmul.f32 %v2288_v49, %v2288_v49  ;;  %v2293_v36 = vmul.f32 %v2289_v31, %v2289_v31 }
 0xb6c   : > { %v2294_v37 = vsel %vm429_vm1, %v2290_v34, 0.0  ;;  %v2295_v25 = vsel %vm429_vm1, %v2291_v35, 0.0  ;;  %v2297_v41 = vsel %vm429_vm1, %v2292_v32, 0.0  ;;  %v2299_v43 = vsel %vm429_vm1, %v2293_v36, 0.0  ;;  %v2878_v34 = vld [vmem:[%s3935_s5 + $0x78] sm:$0xff] }
 0xb6d   : > { %v2296_v40 = vadd.f32 %v2295_v25, %v2294_v37  ;;  %v2418_v25 = vpop.permute.xlu1 %2417 }
 0xb6f   : > { %v2298_v42 = vadd.f32 %v2297_v41, %v2296_v40  ;;  %v2413_v41 = vpop.permute.xlu2 %2412 }
 0xb71   : > { %v2300_v4 = vadd.f32 %v2299_v43, %v2298_v42 }
 0xb73   : > { %v2301_v5 = vrot.slane %v2300_v4, 4 }
 0xb75   : > { %v2302_v38 = vadd.f32 %v2301_v5, %v2300_v4  ;;  %v2408_v42 = vpop.permute.xlu1 %2407 }
 0xb77   : > { %v2303_v20 = vrot.slane %v2302_v38, 2  ;;  %v2398_v4 = vpop.permute.xlu2 %2397 }
 0xb79   : > { %v2304_v39 = vadd.f32 %v2303_v20, %v2302_v38  ;;  %v2403_v38 = vpop.permute.xlu0 %2402 }
 0xb7b   : > { %v2305_v47 = vrot.slane %v2304_v39, 1 }
 0xb7d   : > { %v2306_v50 = vadd.f32 %v2305_v47, %v2304_v39  ;;  %v2393_v5 = vpop.permute.xlu1 %2392 }
 0xb7f   : > { %v2307_v52 = vmul.f32 %v2306_v50, %v3294_v15 }
 0xb81   : > { %v2308_v53 = vadd.f32 1e-05, %v2307_v52 }
 0xb83   : > { %3059 = vrsqrt.f32 %v2308_v53  ;;  %vm2315_vm4 = vweird.f32 %v2308_v53 }
 0xb89   : > { %v3060_v8 = vpop.eup %3059 }
 0xb8a   : > { %v2310_v54 = vmul.f32 %v3060_v8, %v2308_v53  ;;  %vm2316_vm1 = vweird.f32 %v3060_v8 }
 0xb8b   : > { %vm2317_vm5 = vmor %vm2315_vm4, %vm2316_vm1 }
 0xb8c   : > { %v2311_v61 = vmul.f32 %v3060_v8, %v2310_v54 }
 0xb8e   : > { %v2312_v30 = vmul.f32 0.5, %v2311_v61 }
 0xb90   : > { %v2313_v60 = vsub.f32 1.5, %v2312_v30 }
 0xb92   : > { %v2314_v62 = vmul.f32 %v3060_v8, %v2313_v60 }
 0xb94   : > { %v2318_v1 = vsel %vm2317_vm5, %v3060_v8, %v2314_v62 }
 0xb95   : > { %v2322_v6 = vmul.f32 %v2318_v1, %v2289_v31  ;;  %v2320_v10 = vmul.f32 %v2318_v1, %v2287_v27  ;;  %v2321_v12 = vmul.f32 %v2318_v1, %v2288_v49  ;;  %v2319_v19 = vmul.f32 %v2318_v1, %v2286_v0  ;;  %v2874_v0 = vld [vmem:[%s3935_s5 + $0x58] sm:$0xff]  ;;  %v2875_v27 = vld [vmem:[%s3935_s5 + $0x60] sm:$0xff]  ;;  %v2876_v49 = vld [vmem:[%s3935_s5 + $0x68] sm:$0xff] }
 0xb96   : > { %v2877_v31 = vld [vmem:[%s3935_s5 + $0x70] sm:$0xff] }
 0xb97   : > { %v2342_v18 = vmul.f32 %v2337_v56, %v2322_v6  ;;  %v2341_v51 = vmul.f32 %v2333_v46, %v2321_v12  ;;  %v2340_v22 = vmul.f32 %v2329_v59, %v2320_v10  ;;  %v2339_v24 = vmul.f32 %v2325_v44, %v2319_v19 }
 0xb99   : > { %v2362_v21 = vadd.f32 %v2357_v57, %v2342_v18  ;;  %v2361_v3 = vadd.f32 %v2353_v2, %v2341_v51  ;;  %v2360_v16 = vadd.f32 %v2349_v45, %v2340_v22  ;;  %v2359_v29 = vadd.f32 %v2345_v26, %v2339_v24 }
 0xb9b   : > { %2456 = vmatpush.msra.mxu2 %v2362_v21 }
 0xb9d   : > { %2457 = vmatpush.msra.mxu2 %v2361_v3 }
 0xb9f   : > { %2458 = vmatpush.msra.mxu2 %v2360_v16 }
 0xba1   : > { %2459 = vmatpush.msra.mxu2 %v2359_v29 }
 0xba2   : > { %2879 = vmatmul.msk.f32.vlgmr.msra.gmra.mxu2 %vm703_vm9, %v2871_v14 }
 0xbaa   : > { %2880 = vmatmul.msk.f32.gmra.mxu2 %vm703_vm9, %v2872_v33 }
 0xbb2   : > { %2881 = vmatmul.msk.f32.gmra.mxu2 %vm703_vm9, %v2873_v11 }
 0xbb8   : > { %v2383_v8 = vpop.permute.xlu1 %2382 }
 0xbba   : > { %2882 = vmatmul.msk.f32.gmra.mxu2 %vm703_vm9, %v2874_v0 }
 0xbc2   : > { %2883 = vmatmul.msk.f32.gmra.mxu2 %vm703_vm9, %v2875_v27 }
 0xbc3   : > { %v2388_v53 = vpop.permute.xlu2 %2387 }
 0xbca   : > { %2884 = vmatmul.msk.f32.gmra.mxu2 %vm703_vm9, %v2876_v49 }
 0xbd2   : > { %2885 = vmatmul.msk.f32.gmra.mxu2 %vm703_vm9, %v2877_v31 }
 0xbda   : > { %2886 = vmatmul.msk.f32.gmra.mxu2 %vm703_vm9, %v2878_v34 }
 0xc25   : > { %v2461_v35 = vpop.f32.mrf.mxu2 }
 0xc26   : > { %v3860_v46 = vadd.f32 %v2461_v35, %v2383_v8 }
 0xc28   : > { %v2485_v12 = vmul.f32 -1.702, %v3860_v46 }
 0xc2a   : > { %v2493_v21 = vmul.f32 1.442695, %v2485_v12 }
 0xc2d   : > { %v2464_v32 = vpop.f32.mrf.mxu2 }
 0xc2e   : > { %v3857_v61 = vadd.f32 %v2464_v32, %v2388_v53  ;;  %v2888_v53 = vld [vmem:[%s3936_s6 + $0x28] sm:$0xff] }
 0xc30   : > { %v2486_v2 = vmul.f32 -1.702, %v3857_v61 }
 0xc32   : > { %v2495_v19 = vmul.f32 1.442695, %v2486_v2 }
 0xc35   : > { %v2467_v36 = vpop.f32.mrf.mxu2 }
 0xc36   : > { %v3855_v54 = vadd.f32 %v2467_v36, %v2393_v5  ;;  %v3102_v5 = vld [vmem:[%s3932_s2 + $0x8] sm:$0xff] }
 0xc38   : > { %v2487_v63 = vmul.f32 -1.702, %v3855_v54 }
 0xc3a   : > { %v2497_v18 = vmul.f32 1.442695, %v2487_v63 }
 0xc3d   : > { %v2470_v37 = vpop.f32.mrf.mxu2 }
 0xc3e   : > { %v3851_v50 = vadd.f32 %v2470_v37, %v2398_v4  ;;  %v3130_v37 = vmov 24  }
 0xc3f   : > { %2982 = vset.pattern.permute.xlu0 %v3130_v37  ;;  %2984 = vset.pattern.permute.xlu1 %v3130_v37 }
 0xc40   : > { %v2488_v30 = vmul.f32 -1.702, %v3851_v50  ;;  %2983 = vset.pattern.permute.xlu2 %v3130_v37 }
 0xc41   : > { %2588 = vperm.xlu2 %2983, %v3102_v5  }
 0xc42   : > { %v2499_v6 = vmul.f32 1.442695, %v2488_v30 }
 0xc45   : > { %v2473_v40 = vpop.f32.mrf.mxu2 }
 0xc46   : > { %v3849_v28 = vadd.f32 %v2473_v40, %v2403_v38  ;;  %v3100_v40 = vld [vmem:[%s3932_s2] sm:$0xff] }
 0xc47   : > { %2584 = vperm.xlu0 %2982, %v3100_v40  }
 0xc48   : > { %v2489_v55 = vmul.f32 -1.702, %v3849_v28 }
 0xc49   : > { %2596 = vperm.xlu2 %2983, %v3654_v58  }
 0xc4a   : > { %v2501_v62 = vmul.f32 1.442695, %v2489_v55  ;;  %v2889_v55 = vld [vmem:[%s3936_s6 + $0x30] sm:$0xff] }
 0xc4d   : > { %v2476_v43 = vpop.f32.mrf.mxu2 }
 0xc4e   : > { %v3847_v39 = vadd.f32 %v2476_v43, %v2408_v42  ;;  %v3101_v42 = vld [vmem:[%s3932_s2 + $0x10] sm:$0xff] }
 0xc4f   : > { %2592 = vperm.xlu1 %2984, %v3101_v42   ;;  %2659 = vrot.lane.b32.xlu0 %v3101_v42, %s3131_s18 }
 0xc50   : > { %v2490_v52 = vmul.f32 -1.702, %v3847_v39 }
 0xc51   : > { %2677 = vrot.lane.b32.xlu2 %v3654_v58, %s3132_s21 }
 0xc52   : > { %v2503_v60 = vmul.f32 1.442695, %v2490_v52 }
 0xc55   : > { %v2479_v20 = vpop.f32.mrf.mxu2 }
 0xc56   : > { %v2480_v47 = vadd.f32 %v2479_v20, %v2413_v41 }
 0xc57   : > { %2661 = vrot.lane.b32.xlu1 %v3654_v58, %s3131_s18  ;;  %2675 = vrot.lane.b32.xlu0 %v3101_v42, %s3132_s21 }
 0xc58   : > { %v2491_v48 = vmul.f32 -1.702, %v2480_v47 }
 0xc59   : > { %2655 = vrot.lane.b32.xlu2 %v3100_v40, %s3131_s18 }
 0xc5a   : > { %v2505_v56 = vmul.f32 1.442695, %v2491_v48 }
 0xc5c   : > { %3061 = vpow2.f32 %v2505_v56  ;;  %v2890_v56 = vld [vmem:[%s3936_s6 + $0x38] sm:$0xff] }
 0xc5d   : > { %v2482_v57 = vpop.f32.mrf.mxu2  ;;  %3063 = vpow2.f32 %v2503_v60 }
 0xc5e   : > { %v2483_v59 = vadd.f32 %v2482_v57, %v2418_v25  ;;  %3065 = vpow2.f32 %v2501_v62 }
 0xc5f   : > { %2657 = vrot.lane.b32.xlu1 %v3102_v5, %s3131_s18  ;;  %2671 = vrot.lane.b32.xlu0 %v3100_v40, %s3132_s21 }
 0xc60   : > { %v2492_v1 = vmul.f32 -1.702, %v2483_v59 }
 0xc62   : > { %v2507_v10 = vmul.f32 1.442695, %v2492_v1  ;;  %v3062_v51 = vpop.eup %3061 }
 0xc63   : > { %v3064_v22 = vpop.eup %3063  ;;  %v2515_v44 = vadd.f32 1.0, %v3062_v51 }
 0xc64   : > { %3067 = vpow2.f32 %v2507_v10  ;;  %v3066_v45 = vpop.eup %3065  ;;  %v2514_v24 = vadd.f32 1.0, %v3064_v22 }
 0xc65   : > { %3069 = vpow2.f32 %v2499_v6  ;;  %v2513_v29 = vadd.f32 1.0, %v3066_v45 }
 0xc66   : > { %3071 = vpow2.f32 %v2497_v18 }
 0xc67   : > { %3073 = vpow2.f32 %v2495_v19  ;;  %2673 = vrot.lane.b32.xlu1 %v3102_v5, %s3132_s21 }
 0xc68   : > { %3075 = vpow2.f32 %v2493_v21 }
 0xc69   : > { %3077 = vrcp.f32 %v2515_v44 }
 0xc6a   : > { %v3068_v3 = vpop.eup %3067 }
 0xc6b   : > { %v2516_v16 = vadd.f32 1.0, %v3068_v3  ;;  %v3070_v26 = vpop.eup %3069 }
 0xc6c   : > { %v3072_v14 = vpop.eup %3071  ;;  %v2512_v33 = vadd.f32 1.0, %v3070_v26 }
 0xc6d   : > { %3079 = vrcp.f32 %v2516_v16  ;;  %v3074_v11 = vpop.eup %3073  ;;  %v2511_v0 = vadd.f32 1.0, %v3072_v14 }
 0xc6e   : > { %3081 = vrcp.f32 %v2514_v24  ;;  %v3076_v17 = vpop.eup %3075  ;;  %v2510_v31 = vadd.f32 1.0, %v3074_v11 }
 0xc6f   : > { %3083 = vrcp.f32 %v2513_v29  ;;  %v3078_v27 = vpop.eup %3077  ;;  %v2509_v32 = vadd.f32 1.0, %v3076_v17 }
 0xc70   : > { %3085 = vrcp.f32 %v2512_v33  ;;  %v2531_v36 = vmul.f32 %v3078_v27, %v2480_v47 }
 0xc71   : > { %3087 = vrcp.f32 %v2511_v0 }
 0xc72   : > { %3089 = vrcp.f32 %v2510_v31 }
 0xc73   : > { %v3080_v49 = vpop.eup %3079  ;;  %3091 = vrcp.f32 %v2509_v32 }
 0xc74   : > { %v2532_v34 = vmul.f32 %v3080_v49, %v2483_v59  ;;  %v3082_v35 = vpop.eup %3081 }
 0xc75   : > { %v3084_v25 = vpop.eup %3083  ;;  %v2530_v41 = vmul.f32 %v3082_v35, %v3847_v39 }
 0xc76   : > { %2558 = vmatpush.msra.mxu3 %v2532_v34  ;;  %v3086_v43 = vpop.eup %3085  ;;  %v2529_v4 = vmul.f32 %v3084_v25, %v3849_v28 }
 0xc77   : > { %v3088_v38 = vpop.eup %3087  ;;  %v2528_v20 = vmul.f32 %v3086_v43, %v3851_v50  ;;  %v2887_v50 = vld [vmem:[%s3936_s6 + $0x20] sm:$0xff] }
 0xc78   : > { %2559 = vmatpush.msra.mxu3 %v2531_v36  ;;  %v3090_v39 = vpop.eup %3089  ;;  %v2527_v47 = vmul.f32 %v3088_v38, %v3855_v54 }
 0xc79   : > { %v3092_v48 = vpop.eup %3091  ;;  %v2526_v52 = vmul.f32 %v3090_v39, %v3857_v61 }
 0xc7a   : > { %2560 = vmatpush.msra.mxu3 %v2530_v41  ;;  %v2525_v28 = vmul.f32 %v3092_v48, %v3860_v46 }
 0xc7c   : > { %2561 = vmatpush.msra.mxu3 %v2529_v4 }
 0xc7e   : > { %2562 = vmatpush.msra.mxu3 %v2528_v20 }
 0xc80   : > { %2563 = vmatpush.msra.mxu3 %v2527_v47 }
 0xc82   : > { %2564 = vmatpush.msra.mxu3 %v2526_v52 }
 0xc84   : > { %2565 = vmatpush.msra.mxu3 %v2525_v28 }
 0xc85   : > { %2891 = vmatmul.msk.f32.vlgmr.msra.gmra.mxu3 %vm358_vm0, %v2887_v50 }
 0xc8d   : > { %2892 = vmatmul.msk.f32.gmra.mxu3 %vm358_vm0, %v2888_v53 }
 0xc95   : > { %2893 = vmatmul.msk.f32.gmra.mxu3 %vm358_vm0, %v2889_v55 }
 0xc9b   : > { %v2589_v57 = vpop.permute.xlu2 %2588 }
 0xc9d   : > { %2894 = vmatmul.msk.f32.gmra.mxu3 %vm358_vm0, %v2890_v56 }
 0xca3   : > { %v2597_v51 = vpop.permute.xlu2 %2596 }
 0xcab   : > { %v2678_v50 = vpop.permute.xlu2 %2677 }
 0xcb9   : > { %v2585_v59 = vpop.permute.xlu0 %2584 }
 0xcc1   : > { %v2593_v46 = vpop.permute.xlu1 %2592  ;;  %v2660_v39 = vpop.permute.xlu0 %2659 }
 0xcc9   : > { %v2662_v20 = vpop.permute.xlu1 %2661 }
 0xcd1   : > { %v2658_v55 = vpop.permute.xlu1 %2657 }
 0xd08   : > { %v2567_v8 = vpop.f32.mrf.mxu3 }
 0xd09   : > { %v2579_v30 = vadd.f32 %v2567_v8, %v3773_v13  ;;  %v2676_v8 = vpop.permute.xlu0 %2675 }
 0xd0b   : > { %v2599_v63 = vadd.f32 %v2585_v59, %v2579_v30  ;;  %v2656_v59 = vpop.permute.xlu2 %2655 }
 0xd0d   : > { %v2604_v10 = vsel %vm2603_vm6, %v2599_v63, 0.0 }
 0xd10   : > { %v2570_v54 = vpop.f32.mrf.mxu3 }
 0xd11   : > { %v2580_v58 = vadd.f32 %v2570_v54, %v3770_v7 }
 0xd13   : > { %v2600_v62 = vadd.f32 %v2589_v57, %v2580_v58 }
 0xd15   : > { %v2605_v2 = vsel %vm2603_vm6, %v2600_v62, 0.0 }
 0xd16   : > { %v2606_v18 = vadd.f32 %v2605_v2, %v2604_v10 }
 0xd18   : > { %v2573_v61 = vpop.f32.mrf.mxu3 }
 0xd19   : > { %v2581_v60 = vadd.f32 %v2573_v61, %v3776_v9 }
 0xd1b   : > { %v2601_v1 = vadd.f32 %v2593_v46, %v2581_v60 }
 0xd1d   : > { %v2607_v12 = vsel %vm2603_vm6, %v2601_v1, 0.0 }
 0xd1e   : > { %v2608_v19 = vadd.f32 %v2607_v12, %v2606_v18  ;;  %v2688_v18 = vld [vmem:[%s3937_s7 + $0x8] sm:$0xff] }
 0xd20   : > { %v2576_v6 = vpop.f32.mrf.mxu3 }
 0xd21   : > { %v2582_v7 = vadd.f32 %v2576_v6, %v3785_v23  ;;  %v2672_v6 = vpop.permute.xlu0 %2671 }
 0xd23   : > { %v2602_v13 = vadd.f32 %v2597_v51, %v2582_v7  ;;  %v2687_v7 = vld [vmem:[%s3937_s7] sm:$0xff] }
 0xd25   : > { %v2609_v9 = vsel %vm2603_vm6, %v2602_v13, 0.0 }
 0xd26   : > { %v2610_v21 = vadd.f32 %v2609_v9, %v2608_v19 }
 0xd28   : > { %v2611_v22 = vrot.slane %v2610_v21, 4 }
 0xd2a   : > { %v2612_v44 = vadd.f32 %v2611_v22, %v2610_v21 }
 0xd2c   : > { %v2613_v45 = vrot.slane %v2612_v44, 2 }
 0xd2e   : > { %v2614_v3 = vadd.f32 %v2613_v45, %v2612_v44 }
 0xd30   : > { %v2615_v24 = vrot.slane %v2614_v3, 1 }
 0xd32   : > { %v2616_v16 = vadd.f32 %v2615_v24, %v2614_v3 }
 0xd34   : > { %v2617_v26 = vmul.f32 %v2616_v16, %v3294_v15 }
 0xd36   : > { %v2621_v29 = vsub.f32 %v2602_v13, %v2617_v26  ;;  %v2618_v14 = vsub.f32 %v2599_v63, %v2617_v26  ;;  %v2619_v33 = vsub.f32 %v2600_v62, %v2617_v26  ;;  %v2620_v11 = vsub.f32 %v2601_v1, %v2617_v26  ;;  %v2674_v63 = vpop.permute.xlu1 %2673 }
 0xd38   : > { %v2622_v23 = vmul.f32 %v2618_v14, %v2618_v14  ;;  %v2623_v17 = vmul.f32 %v2619_v33, %v2619_v33  ;;  %v2624_v0 = vmul.f32 %v2620_v11, %v2620_v11  ;;  %v2625_v27 = vmul.f32 %v2621_v29, %v2621_v29 }
 0xd3a   : > { %v2626_v49 = vsel %vm2603_vm6, %v2622_v23, 0.0  ;;  %v2627_v31 = vsel %vm2603_vm6, %v2623_v17, 0.0  ;;  %v2629_v35 = vsel %vm2603_vm6, %v2624_v0, 0.0  ;;  %v2631_v36 = vsel %vm2603_vm6, %v2625_v27, 0.0 }
 0xd3b   : > { %v2628_v34 = vadd.f32 %v2627_v31, %v2626_v49 }
 0xd3d   : > { %v2630_v32 = vadd.f32 %v2629_v35, %v2628_v34 }
 0xd3f   : > { %v2632_v37 = vadd.f32 %v2631_v36, %v2630_v32 }
 0xd41   : > { %v2633_v25 = vrot.slane %v2632_v37, 4 }
 0xd43   : > { %v2634_v40 = vadd.f32 %v2633_v25, %v2632_v37 }
 0xd45   : > { %v2635_v41 = vrot.slane %v2634_v40, 2 }
 0xd47   : > { %v2636_v42 = vadd.f32 %v2635_v41, %v2634_v40 }
 0xd49   : > { %v2637_v43 = vrot.slane %v2636_v42, 1 }
 0xd4b   : > { %v2638_v4 = vadd.f32 %v2637_v43, %v2636_v42 }
 0xd4d   : > { %v2639_v5 = vmul.f32 %v2638_v4, %v3294_v15 }
 0xd4f   : > { %v2640_v38 = vadd.f32 1e-05, %v2639_v5 }
 0xd51   : > { %3093 = vrsqrt.f32 %v2640_v38  ;;  %vm2647_vm7 = vweird.f32 %v2640_v38 }
 0xd57   : > { %v3094_v47 = vpop.eup %3093 }
 0xd58   : > { %v2642_v48 = vmul.f32 %v3094_v47, %v2640_v38  ;;  %vm2648_vm0 = vweird.f32 %v3094_v47 }
 0xd59   : > { %vm2649_vm8 = vmor %vm2647_vm7, %vm2648_vm0 }
 0xd5a   : > { %v2643_v52 = vmul.f32 %v3094_v47, %v2642_v48 }
 0xd5c   : > { %v2644_v28 = vmul.f32 0.5, %v2643_v52 }
 0xd5e   : > { %v2645_v53 = vsub.f32 1.5, %v2644_v28 }
 0xd60   : > { %v2646_v56 = vmul.f32 %v3094_v47, %v2645_v53 }
 0xd62   : > { %v2650_v54 = vsel %vm2649_vm8, %v3094_v47, %v2646_v56 }
 0xd63   : > { %v2653_v58 = vmul.f32 %v2650_v54, %v2620_v11  ;;  %v2654_v57 = vmul.f32 %v2650_v54, %v2621_v29  ;;  %v2652_v15 = vmul.f32 %v2650_v54, %v2619_v33  ;;  %v2651_v60 = vmul.f32 %v2650_v54, %v2618_v14 }
 0xd65   : > { %v2669_v61 = vmul.f32 %v2660_v39, %v2653_v58  ;;  %v2670_v30 = vmul.f32 %v2662_v20, %v2654_v57  ;;  %v2668_v62 = vmul.f32 %v2658_v55, %v2652_v15  ;;  %v2667_v2 = vmul.f32 %v2656_v59, %v2651_v60 }
 0xd67   : > { %v2686_v46 = vadd.f32 %v2678_v50, %v2670_v30  ;;  %v2685_v1 = vadd.f32 %v2676_v8, %v2669_v61  ;;  %v2684_v10 = vadd.f32 %v2674_v63, %v2668_v62  ;;  %v2683_v12 = vadd.f32 %v2672_v6, %v2667_v2 }
 0xd69   : > { %2707 = vmatpush.msrb.mxu0 %v2686_v46 }
 0xd6b   : > { %2708 = vmatpush.msrb.mxu0 %v2685_v1 }
 0xd6d   : > { %2709 = vmatpush.msrb.mxu0 %v2684_v10 }
 0xd6f   : > { %2710 = vmatpush.msrb.mxu0 %v2683_v12 }
 0xd70   : > { %2895 = vmatmul.msk.f32.vlgmr.msrb.gmra.mxu0 %vm703_vm9, %v2687_v7 }
 0xd78   : > { %2896 = vmatmul.msk.f32.gmra.mxu0 %vm703_vm9, %v2688_v18 }
 0xded   : > { %v2712_v51 = vpop.f32.mrf.mxu0 }
 0xdee   : > { %2718 = vst.msk [vmem:[%s305_s15] sm:$0xff] %vm2603_vm6, %v2712_v51 }
 0xdf5   : > { %v2715_v13 = vpop.f32.mrf.mxu0 }
 0xdf6   : > { %2719 = vst.msk [vmem:[%s305_s15 + $0x8] sm:$0xff] %vm2603_vm6, %v2715_v13 }
 0xdf7 PF: > { %s18_s27 = sadd.s32 1, %s3109_s27  }
 0xdf8   : > { %p15_p4 = scmp.ge.s32.totalorder %s18_s27, 4  }
 0xdfa   :  { %17 = sbr.rel (!%p15_p4) target bundleno = 1 (0x1), region = 86 }

</bundles_post_ra>
